<compile_context>
chip_gen: v7x
topology: tpu7x:2x2x1
jax: 0.10.0
libtpu: 0.0.40
codegen_flags: <defaults>
</compile_context>

<pallas_src>
import jax
import jax.numpy as jnp
from jax.experimental import pallas as pl
from jax.experimental.pallas import tpu as pltpu

BN_EPS = 1e-5
LEAKY_SLOPE = 0.1

# softmax row-sum == 1 (exact math; f32 softmax keeps this to ~1e-7 even with bf16 matmuls)
#   =>  both renormalizations become compile-time constants.
_ATTN_RENORM = 1.0 / (1.0 + 1e-9)            # divides softmax'd attention by (1e-9 + 1)
_MEM_RENORM = 1.0 / (1e-9 + _ATTN_RENORM)    # divides memory softmax by (1e-9 + attn row-sum)


def _leaky(x):
    # LeakyReLU(0.1): max(x, 0.1*x) is exact for slope < 1.
    return jnp.maximum(x, LEAKY_SLOPE * x)


def _bn_leaky(x, gamma, beta):
    # BatchNorm1d in train mode: per-channel batch stats over the N axis, biased variance.
    # Centered two-pass variance (avoids E[x^2]-E[x]^2 cancellation for large channel means).
    inv_n = 1.0 / x.shape[0]
    mean = jnp.sum(x, axis=0, keepdims=True) * inv_n
    xc = x - mean
    var = jnp.sum(xc * xc, axis=0, keepdims=True) * inv_n
    scale = gamma * jax.lax.rsqrt(var + BN_EPS)
    return _leaky(xc * scale + beta)


def _softmax_rows(x, renorm):
    # Row softmax in f32 with the renormalization constant folded into the per-row scale.
    # approx=True -> single EUP vrcp in an otherwise idle bundle slot (error ~1e-3 rel).
    m = jnp.max(x, axis=-1, keepdims=True)
    p = jnp.exp(x - m)
    denom = jnp.sum(p, axis=-1, keepdims=True)
    return p * (pl.reciprocal(denom, approx=True) * renorm)


def _make_kernel(matmul_dtype):
    """Build the per-sample kernel; `matmul_dtype` controls MXU operand dtype (accum stays f32)."""

    def mm(a, b):
        return jnp.dot(a.astype(matmul_dtype), b.astype(matmul_dtype),
                       preferred_element_type=jnp.float32)

    def mm_rhs_t(a, b):
        # a @ b.T via dot_general contracting dim 1 with dim 1 (no materialized transpose).
        return jax.lax.dot_general(a.astype(matmul_dtype), b.astype(matmul_dtype),
                                   (((1,), (1,)), ((), ())),
                                   preferred_element_type=jnp.float32)

    def kernel(feat_ref, w_qkvm_ref, bn_qkvm_ref, w_mu1_ref, bn_mu1_ref, bn_an_ref, out_ref):
        feat = feat_ref[...]                                                  # (N, C)
        c = feat.shape[1]

        # Fused q/k/v/mu_2 projection: one lane-dense (N, C) @ (C, 4C) MXU matmul.
        # (Linear biases omitted: exactly cancelled by the BatchNorm mean subtraction.)
        proj = mm(feat, w_qkvm_ref[...])                                      # (N, 4C)
        proj = _bn_leaky(proj, bn_qkvm_ref[0:1, :], bn_qkvm_ref[1:2, :])

        # q/k sit at lane offset 0 (latency-critical attention path); mem_v is only an
        # elementwise consumer so its lane offset is irrelevant.
        x_q = proj[:, 0 * c:1 * c]
        x_k = proj[:, 1 * c:2 * c]
        x_v = proj[:, 2 * c:3 * c]
        mem_v = proj[:, 3 * c:4 * c]

        # Point-to-point attention: q . k^T, softmax (constant-folded renorm), attn @ v.
        energy = mm_rhs_t(x_q, x_k)                                           # (N, N)
        attention = _softmax_rows(energy, _ATTN_RENORM)
        x_attn = mm(attention, x_v)                                           # (N, C)

        # Memory branch: mu_1(x_q), softmax over channels, constant renorm, gate by mu_2(features).
        mem_e = mm(x_q, w_mu1_ref[...])                                       # (N, C)
        mem_e = _bn_leaky(mem_e, bn_mu1_ref[0:1, :], bn_mu1_ref[1:2, :])
        mem_attn = _softmax_rows(mem_e, _MEM_RENORM)
        mem_raw = mem_attn * mem_v

        # Fused after_norm: both branches normalized in one (N, 2C) BN sweep (per-channel stats
        # over N are independent per lane, so this is exactly two separate BatchNorm1d calls).
        gamma_an = bn_an_ref[0:1, :]
        beta_an = bn_an_ref[1:2, :]
        both = jnp.concatenate([x_attn, mem_raw], axis=1)                     # (N, 2C)
        both = _bn_leaky(both,
                         jnp.concatenate([gamma_an, gamma_an], axis=1),
                         jnp.concatenate([beta_an, beta_an], axis=1))

        out_ref[...] = _leaky(both[:, :c] + feat + both[:, c:])

    return kernel


def pack_sattention_params(w, b, gamma, beta):
    """One-time (init-time) host-side repacking of PyTorch-layout parameters.

    w: (5, C, C) with (out_dim, in_dim) layout, slots [q, k, v, mu_1, mu_2].
    b: (5, C) linear biases (provably cancelled by the following BatchNorm -> unused).
    gamma/beta: (6, C), slots [q, k, v, mu_1, mu_2, after_norm].
    Returns lane-dense, already-transposed slabs the MXU consumes directly.
    """
    del b  # bias-before-BatchNorm is a mathematical no-op
    wT = jnp.transpose(w, (0, 2, 1))                                         # (5, C, C), (in, out)
    w_qkvm = jnp.concatenate([wT[0], wT[1], wT[2], wT[4]], axis=1)           # (C, 4C)
    w_mu1 = wT[3]                                                            # (C, C)
    bn_qkvm = jnp.stack([jnp.concatenate([gamma[0], gamma[1], gamma[2], gamma[4]]),
                         jnp.concatenate([beta[0], beta[1], beta[2], beta[4]])])  # (2, 4C)
    bn_mu1 = jnp.stack([gamma[3], beta[3]])                                  # (2, C)
    bn_an = jnp.stack([gamma[5], beta[5]])                                   # (2, C)
    return w_qkvm, bn_qkvm, w_mu1, bn_mu1, bn_an


def sattention_forward(features, packed_params, *, matmul_dtype=jnp.float32):
    """features: (B, N, C) or (N, C). packed_params: output of pack_sattention_params().

    matmul_dtype=jnp.bfloat16 casts only the MXU operands (f32 accumulation, f32 BN/softmax);
    recommended on v6e/v7x for large N, keep f32 on v5e / when bit-level parity matters.
    """
    squeeze = features.ndim == 2
    if squeeze:
        features = features[None]
    B, N, C = features.shape
    w_qkvm, bn_qkvm, w_mu1, bn_mu1, bn_an = packed_params

    # TODO(synk): for large N, tile the query axis (online softmax) so the (N, N) attention never
    # materializes in VMEM (64 MiB physical on v7x); BN statistics must then be accumulated over
    # the FULL N axis (two-pass / cross-tile), not per query tile.
    # TODO(synk): at production batch sizes, pack 4 samples along the lane axis (4*C = 128) for
    # the elementwise/BN/store sections (unmasked vst, full VPU lanes); needs a lane-segmented
    # reduction for the memory-branch channel softmax.
    out = pl.pallas_call(
        _make_kernel(matmul_dtype),
        out_shape=jax.ShapeDtypeStruct((B, N, C), jnp.float32),
        grid=(B,),
        in_specs=[
            # One sample per grid step (leading batch dim squeezed out of the kernel ref).
            pl.BlockSpec((None, N, C), lambda b: (b, 0, 0)),
            # Weights / BN params: constant block index -> DMA'd once, VMEM-resident across B.
            pl.BlockSpec((C, 4 * C), lambda b: (0, 0)),
            pl.BlockSpec((2, 4 * C), lambda b: (0, 0)),
            pl.BlockSpec((C, C), lambda b: (0, 0)),
            pl.BlockSpec((2, C), lambda b: (0, 0)),
            pl.BlockSpec((2, C), lambda b: (0, 0)),
        ],
        out_specs=pl.BlockSpec((None, N, C), lambda b: (b, 0, 0)),
        compiler_params=pltpu.CompilerParams(
            # Samples are independent: "parallel" lets Mosaic shard the batch axis across the
            # two v7x TensorCores and pipeline feature DMA against compute on all chips.
            dimension_semantics=("parallel",),
            # Raise v5e's 16 MiB scoped-VMEM default; equals the v6e/v7x default (no-op there).
            vmem_limit_bytes=32 * 1024 * 1024,
        ),
    )(features, w_qkvm, bn_qkvm, w_mu1, bn_mu1, bn_an)
    return out[0] if squeeze else out


def sattention_reference(features, w, b, gamma, beta):
    """Faithful (unfused, PyTorch-literal, per-sample) pure-JAX forward, used only for validation."""
    def batch_norm(x, g, bt):
        mean = jnp.mean(x, axis=0, keepdims=True)
        var = jnp.mean((x - mean) ** 2, axis=0, keepdims=True)
        return g * (x - mean) * jax.lax.rsqrt(var + BN_EPS) + bt

    def leaky(x):
        return jnp.where(x >= 0, x, LEAKY_SLOPE * x)

    def shared_mlp(x, wi, bi, g, bt):
        y = jnp.dot(x, wi.T, preferred_element_type=jnp.float32) + bi
        return leaky(batch_norm(y, g, bt))

    def softmax_last(x):
        m = jnp.max(x, axis=-1, keepdims=True)
        e = jnp.exp(x - m)
        return e / jnp.sum(e, axis=-1, keepdims=True)

    x_q = shared_mlp(features, w[0], b[0], gamma[0], beta[0])
    x_k = shared_mlp(features, w[1], b[1], gamma[1], beta[1])
    x_v = shared_mlp(features, w[2], b[2], gamma[2], beta[2])

    energy = jnp.dot(x_q, x_k.T, preferred_element_type=jnp.float32)
    attention = softmax_last(energy)
    attention = attention / (1e-9 + jnp.sum(attention, axis=1, keepdims=True))
    x = jnp.dot(attention, x_v, preferred_element_type=jnp.float32)
    x = leaky(batch_norm(x, gamma[5], beta[5]))

    memory_v = shared_mlp(features, w[4], b[4], gamma[4], beta[4])
    memory_energy = shared_mlp(x_q, w[3], b[3], gamma[3], beta[3])
    memory_attention = softmax_last(memory_energy)
    memory_attention = memory_attention / (1e-9 + jnp.sum(attention, axis=1, keepdims=True))
    memory_out = memory_attention * memory_v
    memory_out = leaky(batch_norm(memory_out, gamma[5], beta[5]))

    return leaky(x + features + memory_out)


if __name__ == "__main__":
    # Small shapes consistent with the module: B samples of N points with C = in_dim = out_dim channels.
    B, N, C = 4, 64, 32

    key = jax.random.PRNGKey(0)
    k_feat, k_w = jax.random.split(key)

    features = jax.random.normal(k_feat, (B, N, C), dtype=jnp.float32)

    # SharedMLPBlock defaults: weight ~ randn, bias = 0; BatchNorm defaults: gamma = 1, beta = 0.
    # Slots: [q, k, v, mu_1, mu_2]; BN slot 5 = after_norm.
    w = jax.random.normal(k_w, (5, C, C), dtype=jnp.float32)
    b = jnp.zeros((5, C), dtype=jnp.float32)
    gamma = jnp.ones((6, C), dtype=jnp.float32)
    beta = jnp.zeros((6, C), dtype=jnp.float32)

    # One-time init-cost packing (hoisted out of the per-call path).
    packed = pack_sattention_params(w, b, gamma, beta)

    out = jax.block_until_ready(sattention_forward(features, packed))
    ref = jnp.stack([sattention_reference(features[i], w, b, gamma, beta) for i in range(B)])

    assert out.shape == (B, N, C)
    assert bool(jnp.all(jnp.isfinite(out)))
    # Tolerance budget: approx EUP reciprocal (~1e-3 rel on softmax scales), constant-folded
    # renormalizations, fused one-matmul projection and the MXU's internal bf16 passes all
    # perturb intermediates at the 1e-6..1e-3 level, and softmax/BN amplify them into the
    # low-1e-3 range. Genuine structural errors would be O(0.1 - 10).
    assert bool(jnp.allclose(out, ref, atol=1e-2, rtol=1e-2)), "kernel/reference mismatch"

    # bf16 MXU-operand path (perf-review item for v6e/v7x at larger N): must compile and stay
    # within a coarse bound of the f32 reference (bf16 operands cost a few percent on attention).
    out_bf16 = jax.block_until_ready(
        sattention_forward(features, packed, matmul_dtype=jnp.bfloat16))
    assert out_bf16.shape == (B, N, C)
    assert bool(jnp.all(jnp.isfinite(out_bf16)))
    assert float(jnp.max(jnp.abs(out_bf16 - ref))) < 1.0, "bf16 path diverged"

    print("KERNEL_OK")
</pallas_src>

<mosaic_0001>
module attributes {stable_mosaic.version = 11 : i64} {
  func.func @kernel(%arg0: i32, %arg1: memref<1x64x32xf32, #tpu.memory_space<vmem>>, %arg2: memref<32x128xf32, #tpu.memory_space<vmem>>, %arg3: memref<2x128xf32, #tpu.memory_space<vmem>>, %arg4: memref<32x32xf32, #tpu.memory_space<vmem>>, %arg5: memref<2x32xf32, #tpu.memory_space<vmem>>, %arg6: memref<2x32xf32, #tpu.memory_space<vmem>>, %arg7: memref<1x64x32xf32, #tpu.memory_space<vmem>>) attributes {dimension_semantics = [#tpu.dimension_semantics<parallel>], iteration_bounds = array<i64: 4>, scalar_prefetch = 0 : i64, scratch_operands = 0 : i64, tpu.core_type = #tpu.core_type<tc>, window_params = [{transform_indices = @transform_0, window_bounds = array<i64: 1, 64, 32>}, {pipeline_mode = #tpu.pipeline_mode<synchronous>, transform_indices = @transform_1, window_bounds = array<i64: 32, 128>}, {pipeline_mode = #tpu.pipeline_mode<synchronous>, transform_indices = @transform_2, window_bounds = array<i64: 2, 128>}, {pipeline_mode = #tpu.pipeline_mode<synchronous>, transform_indices = @transform_3, window_bounds = array<i64: 32, 32>}, {pipeline_mode = #tpu.pipeline_mode<synchronous>, transform_indices = @transform_4, window_bounds = array<i64: 2, 32>}, {pipeline_mode = #tpu.pipeline_mode<synchronous>, transform_indices = @transform_5, window_bounds = array<i64: 2, 32>}, {transform_indices = @transform_6, window_bounds = array<i64: 1, 64, 32>}]} {
    %c0 = arith.constant 0 : index
    %c0_0 = arith.constant 0 : index
    %c0_1 = arith.constant 0 : index
    %0 = vector.load %arg1[%c0, %c0_0, %c0_1] : memref<1x64x32xf32, #tpu.memory_space<vmem>>, vector<1x64x32xf32>
    %1 = vector.shape_cast %0 : vector<1x64x32xf32> to vector<64x32xf32>
    %c0_2 = arith.constant 0 : index
    %c0_3 = arith.constant 0 : index
    %2 = vector.load %arg2[%c0_2, %c0_3] : memref<32x128xf32, #tpu.memory_space<vmem>>, vector<32x128xf32>
    %cst = arith.constant dense<0.000000e+00> : vector<64x128xf32>
    %3 = tpu.matmul %1, %2, %cst {dimension_numbers = #tpu.dot_dimension_numbers<[1], [0], [0], [1], [0, 0, 1, 1], [], []>} : vector<64x32xf32>, vector<32x128xf32>, vector<64x128xf32> -> vector<64x128xf32>
    %c0_4 = arith.constant 0 : index
    %c0_5 = arith.constant 0 : index
    %4 = vector.load %arg3[%c0_4, %c0_5] : memref<2x128xf32, #tpu.memory_space<vmem>>, vector<1x128xf32>
    %c1 = arith.constant 1 : index
    %c0_6 = arith.constant 0 : index
    %5 = vector.load %arg3[%c1, %c0_6] : memref<2x128xf32, #tpu.memory_space<vmem>>, vector<1x128xf32>
    %cst_7 = arith.constant dense<0.000000e+00> : vector<128xf32>
    %6 = vector.multi_reduction <add>, %3, %cst_7 [0] : vector<64x128xf32> to vector<128xf32>
    %7 = vector.shape_cast %6 : vector<128xf32> to vector<1x128xf32>
    %cst_8 = arith.constant 1.562500e-02 : f32
    %8 = vector.broadcast %cst_8 : f32 to vector<1x128xf32>
    %9 = arith.mulf %7, %8 : vector<1x128xf32>
    %10 = vector.broadcast %9 : vector<1x128xf32> to vector<64x128xf32>
    %11 = arith.subf %3, %10 : vector<64x128xf32>
    %12 = arith.mulf %11, %11 : vector<64x128xf32>
    %cst_9 = arith.constant dense<0.000000e+00> : vector<128xf32>
    %13 = vector.multi_reduction <add>, %12, %cst_9 [0] : vector<64x128xf32> to vector<128xf32>
    %14 = vector.shape_cast %13 : vector<128xf32> to vector<1x128xf32>
    %cst_10 = arith.constant 1.562500e-02 : f32
    %15 = vector.broadcast %cst_10 : f32 to vector<1x128xf32>
    %16 = arith.mulf %14, %15 : vector<1x128xf32>
    %cst_11 = arith.constant 9.99999974E-6 : f32
    %17 = vector.broadcast %cst_11 : f32 to vector<1x128xf32>
    %18 = arith.addf %16, %17 : vector<1x128xf32>
    %19 = math.rsqrt %18 : vector<1x128xf32>
    %20 = arith.mulf %4, %19 : vector<1x128xf32>
    %21 = vector.broadcast %20 : vector<1x128xf32> to vector<64x128xf32>
    %22 = arith.mulf %11, %21 : vector<64x128xf32>
    %23 = vector.broadcast %5 : vector<1x128xf32> to vector<64x128xf32>
    %24 = arith.addf %22, %23 : vector<64x128xf32>
    %cst_12 = arith.constant 1.000000e-01 : f32
    %25 = vector.broadcast %cst_12 : f32 to vector<64x128xf32>
    %26 = arith.mulf %25, %24 : vector<64x128xf32>
    %27 = arith.maximumf %24, %26 : vector<64x128xf32>
    %28 = vector.extract_strided_slice %27 {offsets = [0, 0], sizes = [64, 32], strides = [1, 1]} : vector<64x128xf32> to vector<64x32xf32>
    %29 = vector.extract_strided_slice %27 {offsets = [0, 32], sizes = [64, 32], strides = [1, 1]} : vector<64x128xf32> to vector<64x32xf32>
    %30 = vector.extract_strided_slice %27 {offsets = [0, 64], sizes = [64, 32], strides = [1, 1]} : vector<64x128xf32> to vector<64x32xf32>
    %31 = vector.extract_strided_slice %27 {offsets = [0, 96], sizes = [64, 32], strides = [1, 1]} : vector<64x128xf32> to vector<64x32xf32>
    %cst_13 = arith.constant dense<0.000000e+00> : vector<64x64xf32>
    %32 = tpu.matmul %28, %29, %cst_13 {dimension_numbers = #tpu.dot_dimension_numbers<[1], [1], [0], [0], [0, 0, 1, 0], [], []>} : vector<64x32xf32>, vector<64x32xf32>, vector<64x64xf32> -> vector<64x64xf32>
    %cst_14 = arith.constant dense<0xFF800000> : vector<64xf32>
    %33 = vector.multi_reduction <maximumf>, %32, %cst_14 [1] : vector<64x64xf32> to vector<64xf32>
    %34 = vector.shape_cast %33 : vector<64xf32> to vector<64x1xf32>
    %35 = vector.broadcast %34 : vector<64x1xf32> to vector<64x64xf32>
    %36 = arith.subf %32, %35 : vector<64x64xf32>
    %37 = math.exp %36 : vector<64x64xf32>
    %cst_15 = arith.constant dense<0.000000e+00> : vector<64xf32>
    %38 = vector.multi_reduction <add>, %37, %cst_15 [1] : vector<64x64xf32> to vector<64xf32>
    %39 = vector.shape_cast %38 : vector<64xf32> to vector<64x1xf32>
    %40 = tpu.reciprocal %39 {approx = true} : vector<64x1xf32> -> vector<64x1xf32>
    %cst_16 = arith.constant 1.000000e+00 : f32
    %41 = vector.broadcast %cst_16 : f32 to vector<64x1xf32>
    %42 = arith.mulf %40, %41 : vector<64x1xf32>
    %43 = vector.broadcast %42 : vector<64x1xf32> to vector<64x64xf32>
    %44 = arith.mulf %37, %43 : vector<64x64xf32>
    %cst_17 = arith.constant dense<0.000000e+00> : vector<64x32xf32>
    %45 = tpu.matmul %44, %30, %cst_17 {dimension_numbers = #tpu.dot_dimension_numbers<[1], [0], [0], [1], [0, 0, 1, 1], [], []>} : vector<64x64xf32>, vector<64x32xf32>, vector<64x32xf32> -> vector<64x32xf32>
    %c0_18 = arith.constant 0 : index
    %c0_19 = arith.constant 0 : index
    %46 = vector.load %arg4[%c0_18, %c0_19] : memref<32x32xf32, #tpu.memory_space<vmem>>, vector<32x32xf32>
    %cst_20 = arith.constant dense<0.000000e+00> : vector<64x32xf32>
    %47 = tpu.matmul %28, %46, %cst_20 {dimension_numbers = #tpu.dot_dimension_numbers<[1], [0], [0], [1], [0, 0, 1, 1], [], []>} : vector<64x32xf32>, vector<32x32xf32>, vector<64x32xf32> -> vector<64x32xf32>
    %c0_21 = arith.constant 0 : index
    %c0_22 = arith.constant 0 : index
    %48 = vector.load %arg5[%c0_21, %c0_22] : memref<2x32xf32, #tpu.memory_space<vmem>>, vector<1x32xf32>
    %c1_23 = arith.constant 1 : index
    %c0_24 = arith.constant 0 : index
    %49 = vector.load %arg5[%c1_23, %c0_24] : memref<2x32xf32, #tpu.memory_space<vmem>>, vector<1x32xf32>
    %cst_25 = arith.constant dense<0.000000e+00> : vector<32xf32>
    %50 = vector.multi_reduction <add>, %47, %cst_25 [0] : vector<64x32xf32> to vector<32xf32>
    %51 = vector.shape_cast %50 : vector<32xf32> to vector<1x32xf32>
    %cst_26 = arith.constant 1.562500e-02 : f32
    %52 = vector.broadcast %cst_26 : f32 to vector<1x32xf32>
    %53 = arith.mulf %51, %52 : vector<1x32xf32>
    %54 = vector.broadcast %53 : vector<1x32xf32> to vector<64x32xf32>
    %55 = arith.subf %47, %54 : vector<64x32xf32>
    %56 = arith.mulf %55, %55 : vector<64x32xf32>
    %cst_27 = arith.constant dense<0.000000e+00> : vector<32xf32>
    %57 = vector.multi_reduction <add>, %56, %cst_27 [0] : vector<64x32xf32> to vector<32xf32>
    %58 = vector.shape_cast %57 : vector<32xf32> to vector<1x32xf32>
    %cst_28 = arith.constant 1.562500e-02 : f32
    %59 = vector.broadcast %cst_28 : f32 to vector<1x32xf32>
    %60 = arith.mulf %58, %59 : vector<1x32xf32>
    %cst_29 = arith.constant 9.99999974E-6 : f32
    %61 = vector.broadcast %cst_29 : f32 to vector<1x32xf32>
    %62 = arith.addf %60, %61 : vector<1x32xf32>
    %63 = math.rsqrt %62 : vector<1x32xf32>
    %64 = arith.mulf %48, %63 : vector<1x32xf32>
    %65 = vector.broadcast %64 : vector<1x32xf32> to vector<64x32xf32>
    %66 = arith.mulf %55, %65 : vector<64x32xf32>
    %67 = vector.broadcast %49 : vector<1x32xf32> to vector<64x32xf32>
    %68 = arith.addf %66, %67 : vector<64x32xf32>
    %cst_30 = arith.constant 1.000000e-01 : f32
    %69 = vector.broadcast %cst_30 : f32 to vector<64x32xf32>
    %70 = arith.mulf %69, %68 : vector<64x32xf32>
    %71 = arith.maximumf %68, %70 : vector<64x32xf32>
    %cst_31 = arith.constant dense<0xFF800000> : vector<64xf32>
    %72 = vector.multi_reduction <maximumf>, %71, %cst_31 [1] : vector<64x32xf32> to vector<64xf32>
    %73 = vector.shape_cast %72 : vector<64xf32> to vector<64x1xf32>
    %74 = vector.broadcast %73 : vector<64x1xf32> to vector<64x32xf32>
    %75 = arith.subf %71, %74 : vector<64x32xf32>
    %76 = math.exp %75 : vector<64x32xf32>
    %cst_32 = arith.constant dense<0.000000e+00> : vector<64xf32>
    %77 = vector.multi_reduction <add>, %76, %cst_32 [1] : vector<64x32xf32> to vector<64xf32>
    %78 = vector.shape_cast %77 : vector<64xf32> to vector<64x1xf32>
    %79 = tpu.reciprocal %78 {approx = true} : vector<64x1xf32> -> vector<64x1xf32>
    %cst_33 = arith.constant 1.000000e+00 : f32
    %80 = vector.broadcast %cst_33 : f32 to vector<64x1xf32>
    %81 = arith.mulf %79, %80 : vector<64x1xf32>
    %82 = vector.broadcast %81 : vector<64x1xf32> to vector<64x32xf32>
    %83 = arith.mulf %76, %82 : vector<64x32xf32>
    %84 = arith.mulf %83, %31 : vector<64x32xf32>
    %c0_34 = arith.constant 0 : index
    %c0_35 = arith.constant 0 : index
    %85 = vector.load %arg6[%c0_34, %c0_35] : memref<2x32xf32, #tpu.memory_space<vmem>>, vector<1x32xf32>
    %c1_36 = arith.constant 1 : index
    %c0_37 = arith.constant 0 : index
    %86 = vector.load %arg6[%c1_36, %c0_37] : memref<2x32xf32, #tpu.memory_space<vmem>>, vector<1x32xf32>
    %87 = tpu.concatenate %45, %84 in 1 : vector<64x32xf32>, vector<64x32xf32> -> vector<64x64xf32>
    %88 = tpu.concatenate %85, %85 in 1 : vector<1x32xf32>, vector<1x32xf32> -> vector<1x64xf32>
    %89 = tpu.concatenate %86, %86 in 1 : vector<1x32xf32>, vector<1x32xf32> -> vector<1x64xf32>
    %cst_38 = arith.constant dense<0.000000e+00> : vector<64xf32>
    %90 = vector.multi_reduction <add>, %87, %cst_38 [0] : vector<64x64xf32> to vector<64xf32>
    %91 = vector.shape_cast %90 : vector<64xf32> to vector<1x64xf32>
    %cst_39 = arith.constant 1.562500e-02 : f32
    %92 = vector.broadcast %cst_39 : f32 to vector<1x64xf32>
    %93 = arith.mulf %91, %92 : vector<1x64xf32>
    %94 = vector.broadcast %93 : vector<1x64xf32> to vector<64x64xf32>
    %95 = arith.subf %87, %94 : vector<64x64xf32>
    %96 = arith.mulf %95, %95 : vector<64x64xf32>
    %cst_40 = arith.constant dense<0.000000e+00> : vector<64xf32>
    %97 = vector.multi_reduction <add>, %96, %cst_40 [0] : vector<64x64xf32> to vector<64xf32>
    %98 = vector.shape_cast %97 : vector<64xf32> to vector<1x64xf32>
    %cst_41 = arith.constant 1.562500e-02 : f32
    %99 = vector.broadcast %cst_41 : f32 to vector<1x64xf32>
    %100 = arith.mulf %98, %99 : vector<1x64xf32>
    %cst_42 = arith.constant 9.99999974E-6 : f32
    %101 = vector.broadcast %cst_42 : f32 to vector<1x64xf32>
    %102 = arith.addf %100, %101 : vector<1x64xf32>
    %103 = math.rsqrt %102 : vector<1x64xf32>
    %104 = arith.mulf %88, %103 : vector<1x64xf32>
    %105 = vector.broadcast %104 : vector<1x64xf32> to vector<64x64xf32>
    %106 = arith.mulf %95, %105 : vector<64x64xf32>
    %107 = vector.broadcast %89 : vector<1x64xf32> to vector<64x64xf32>
    %108 = arith.addf %106, %107 : vector<64x64xf32>
    %cst_43 = arith.constant 1.000000e-01 : f32
    %109 = vector.broadcast %cst_43 : f32 to vector<64x64xf32>
    %110 = arith.mulf %109, %108 : vector<64x64xf32>
    %111 = arith.maximumf %108, %110 : vector<64x64xf32>
    %112 = vector.extract_strided_slice %111 {offsets = [0, 0], sizes = [64, 32], strides = [1, 1]} : vector<64x64xf32> to vector<64x32xf32>
    %113 = arith.addf %112, %1 : vector<64x32xf32>
    %114 = vector.extract_strided_slice %111 {offsets = [0, 32], sizes = [64, 32], strides = [1, 1]} : vector<64x64xf32> to vector<64x32xf32>
    %115 = arith.addf %113, %114 : vector<64x32xf32>
    %cst_44 = arith.constant 1.000000e-01 : f32
    %116 = vector.broadcast %cst_44 : f32 to vector<64x32xf32>
    %117 = arith.mulf %116, %115 : vector<64x32xf32>
    %118 = arith.maximumf %115, %117 : vector<64x32xf32>
    %c0_45 = arith.constant 0 : index
    %c0_46 = arith.constant 0 : index
    %c0_47 = arith.constant 0 : index
    %119 = vector.load %arg7[%c0_45, %c0_46, %c0_47] : memref<1x64x32xf32, #tpu.memory_space<vmem>>, vector<1x64x32xf32>
    %120 = vector.shape_cast %119 : vector<1x64x32xf32> to vector<64x32xf32>
    %121 = vector.shape_cast %118 : vector<64x32xf32> to vector<1x64x32xf32>
    tpu.vector_store %arg7[%c0_45, %c0_46, %c0_47], %121 {strides = array<i32>} : memref<1x64x32xf32, #tpu.memory_space<vmem>>, vector<1x64x32xf32>,
    return
  }
  func.func @transform_0(%arg0: i32) -> (i32, i32, i32) {
    %c0_i32 = arith.constant 0 : i32
    %c0_i32_0 = arith.constant 0 : i32
    %c0_i32_1 = arith.constant 0 : i32
    return %arg0, %c0_i32, %c0_i32_0 : i32, i32, i32
  }
  func.func @transform_1(%arg0: i32) -> (i32, i32) {
    %c0_i32 = arith.constant 0 : i32
    %c0_i32_0 = arith.constant 0 : i32
    %c0_i32_1 = arith.constant 0 : i32
    return %c0_i32, %c0_i32_0 : i32, i32
  }
  func.func @transform_2(%arg0: i32) -> (i32, i32) {
    %c0_i32 = arith.constant 0 : i32
    %c0_i32_0 = arith.constant 0 : i32
    %c0_i32_1 = arith.constant 0 : i32
    return %c0_i32, %c0_i32_0 : i32, i32
  }
  func.func @transform_3(%arg0: i32) -> (i32, i32) {
    %c0_i32 = arith.constant 0 : i32
    %c0_i32_0 = arith.constant 0 : i32
    %c0_i32_1 = arith.constant 0 : i32
    return %c0_i32, %c0_i32_0 : i32, i32
  }
  func.func @transform_4(%arg0: i32) -> (i32, i32) {
    %c0_i32 = arith.constant 0 : i32
    %c0_i32_0 = arith.constant 0 : i32
    %c0_i32_1 = arith.constant 0 : i32
    return %c0_i32, %c0_i32_0 : i32, i32
  }
  func.func @transform_5(%arg0: i32) -> (i32, i32) {
    %c0_i32 = arith.constant 0 : i32
    %c0_i32_0 = arith.constant 0 : i32
    %c0_i32_1 = arith.constant 0 : i32
    return %c0_i32, %c0_i32_0 : i32, i32
  }
  func.func @transform_6(%arg0: i32) -> (i32, i32, i32) {
    %c0_i32 = arith.constant 0 : i32
    %c0_i32_0 = arith.constant 0 : i32
    %c0_i32_1 = arith.constant 0 : i32
    return %arg0, %c0_i32, %c0_i32_0 : i32, i32, i32
  }
}

</mosaic_0001>

<bundles_post_ra>
// kernel: tpu_custom_call.1
= control target key start
LH: loop header
LB: loop body
LE: loop exit
PB: predicated region body
PF: predicated region fallthrough
CT: control target
= control target key end

     0   :  { %s1948_s21 = smov 0   ;;  %s2338_s0 = inlined_call_operand.vmem [shape: f32[4,64,32], index: 0, kind: input, shape index: {}]   ;;  %s2339_s1 = inlined_call_operand.vmem [shape: f32[32,128], index: 1, kind: input, shape index: {}]   ;;  %s2340_s2 = inlined_call_operand.vmem [shape: f32[2,128], index: 2, kind: input, shape index: {}]   ;;  %s2341_s3 = inlined_call_operand.vmem [shape: f32[32,32], index: 3, kind: input, shape index: {}]   ;;  %s2342_s4 = inlined_call_operand.vmem [shape: f32[2,32], index: 4, kind: input, shape index: {}]   ;;  %s2343_s5 = inlined_call_operand.vmem [shape: f32[2,32], index: 5, kind: input, shape index: {}]   ;;  %s2344_s6 = inlined_call_operand.vmem [shape: f32[4,64,32], index: 6, kind: output, shape index: {}]  }
   0x1 LB: > { %s1502_s22 = sadd.s32 4294967295, %s1908_s21   ;;  %p1506_p0 = scmp.ge.s32.totalorder %s1908_s21, 1  ;;  %s1908_s21 = sphi %s1948_s21, %s16_s21  }
   0x2   : > { %p212_p1 = scmp.lt.s32.totalorder %s1908_s21, 5 }
   0x4   : > { %p213_p2 = pnand %p1506_p0, %p212_p1 }
   0x5   : > { %v260_v0 = vld [vmem:[%s2339_s1] sm:$0xff] (!%p213_p2)  ;;  %v261_v1 = vld [vmem:[%s2339_s1 + $0x8] sm:$0xff] (!%p213_p2)  ;;  %v262_v2 = vld [vmem:[%s2339_s1 + $0x10] sm:$0xff] (!%p213_p2)  ;;  %p242_p3 = scmp.lt.s32.totalorder (!%p213_p2), %s1502_s22, 3  ;;  %vm264_vm0 = vcmask (!%p213_p2), 261120   ;;  %s1910_s15 = smov (!%p213_p2), 96  }
   0x6   : > { %216 = sbr.rel (%p213_p2) target bundleno = 2025 (0x7e9), region = 44  ;;  %v1709_v3 = vpack.c.bf16 (!%p213_p2), %v261_v1, %v260_v0  ;;  %v263_v4 = vld [vmem:[%s2339_s1 + $0x18] sm:$0xff] (!%p213_p2)  ;;  %vm2044_vm1 = vmpackc.low (!%p213_p2), %vm264_vm0, %vm264_vm0  ;;  %vm644_vm2 = vcmask (!%p213_p2), 523264   ;;  %s1911_s16 = smov (!%p213_p2), 64  }
   0x7   : > { %v1713_v5 = vpack.c.bf16 (!%p213_p2), %v263_v4, %v262_v2  ;;  %s1912_s8 = smov (!%p213_p2), 32  }
   0x8   : > { %1710 = vmatprep.subr.bf16.mxu0 (!%p213_p2), %v1709_v3 }
   0x9   : > { %1712 = vmatpush3.bf16.msra.mxu0 (!%p213_p2), %v1709_v3  ;;  %v443_v3 = vlaneseq (!%p213_p2) }
   0xa   : > { %1714 = vmatprep.subr.bf16.mxu0 (!%p213_p2), %v1713_v5 }
   0xb   : > { %v444_v4 = vshrl.u32 (!%p213_p2), %v443_v3, 7 }
   0xd   : > { %s2348_s22 = smov (!%p242_p3, %s1502_s22), 3  ;;  %1716 = vmatpush3.bf16.msra.mxu0 %v1713_v5  ;;  %v394_v5 = vld [vmem:[%s2340_s2] sm:$0x1] }
   0xe   : > { %s1555_s7 = sshll.u32 %s2348_s22, 6 }
   0xf   : > { %s1976_s10 = scalar_lea.vmem %s2338_s0, %s1555_s7 }
  0x10   : > { %v252_v6 = vld [vmem:[%s1976_s10] sm:$0xff]  ;;  %v253_v7 = vld [vmem:[%s1976_s10 + $0x8] sm:$0xff]  ;;  %v254_v8 = vld [vmem:[%s1976_s10 + $0x10] sm:$0xff] }
  0x11   : > { %1621 = vmatprep.mubr.msk.f32.mxu0 %vm264_vm0, %v252_v6  ;;  %v255_v9 = vld [vmem:[%s1976_s10 + $0x18] sm:$0xff]  ;;  %v256_v10 = vld [vmem:[%s1976_s10 + $0x20] sm:$0xff]  ;;  %v257_v11 = vld [vmem:[%s1976_s10 + $0x28] sm:$0xff]  ;;  %v1997_v6 = vsub.s32 0, %v444_v4 }
  0x12   : > { %1622 = vmatmul.mubr.msk.f32.vlgmr.msra.gmra.mrb[0].mxu0 %vm264_vm0, %v253_v7  ;;  %v258_v12 = vld [vmem:[%s1976_s10 + $0x30] sm:$0xff]  ;;  %v259_v13 = vld [vmem:[%s1976_s10 + $0x38] sm:$0xff] }
  0x13   : > { %1624 = vmatprep.mubr.msk.f32.mxu0 %vm264_vm0, %v254_v8 }
  0x16   : > { %1625 = vmatmul.mubr.msk.f32.gmra.mrb[2].mxu0 %vm264_vm0, %v255_v9 }
  0x17   : > { %1627 = vmatprep.mubr.msk.f32.mxu0 %vm264_vm0, %v256_v10  ;;  %v1519_v10 = vld [vmem:[%s2340_s2 + $0x1] ss:$0 sm:$0xff] }
  0x1a   : > { %1628 = vmatmul.mubr.msk.f32.gmra.mrb[4].mxu0 %vm264_vm0, %v257_v11 }
  0x1b   : > { %1630 = vmatprep.mubr.msk.f32.mxu0 %vm264_vm0, %v258_v12 }
  0x1e   : > { %1631 = vmatmul.mubr.msk.f32.gmra.mrb[6].mxu0 %vm264_vm0, %v259_v13 }
  0xe5   : > { %v1623_v14 = vpop.f32.mrb[0].mxu0 }
  0xe6   : > { %v355_v15 = vpop.f32.mrb[1].mxu0 }
  0xe7   : > { %v396_v16 = vadd.f32 %v1623_v14, %v355_v15 }
  0xe9   : > { %v1626_v17 = vpop.f32.mrb[2].mxu0 }
  0xea   : > { %v365_v18 = vpop.f32.mrb[3].mxu0 }
  0xeb   : > { %v397_v19 = vadd.f32 %v396_v16, %v365_v18 }
  0xed   : > { %v1629_v20 = vpop.f32.mrb[4].mxu0  ;;  %v398_v21 = vadd.f32 %v1626_v17, %v397_v19 }
  0xee   : > { %v375_v22 = vpop.f32.mrb[5].mxu0 }
  0xef   : > { %v399_v23 = vadd.f32 %v398_v21, %v375_v22 }
  0xf1   : > { %v1632_v24 = vpop.f32.mrb[6].mxu0  ;;  %v400_v25 = vadd.f32 %v1629_v20, %v399_v23 }
  0xf2   : > { %v385_v26 = vpop.f32.mrb[7].mxu0 }
  0xf3   : > { %v401_v27 = vadd.f32 %v400_v25, %v385_v26 }
  0xf5   : > { %v402_v28 = vadd.f32 %v1632_v24, %v401_v27 }
  0xf7   : > { %v403_v29 = vrot.slane %v402_v28, 4 }
  0xf9   : > { %v404_v30 = vadd.f32 %v403_v29, %v402_v28 }
  0xfb   : > { %v405_v31 = vrot.slane %v404_v30, 2 }
  0xfd   : > { %v406_v32 = vadd.f32 %v405_v31, %v404_v30 }
  0xff   : > { %v407_v33 = vrot.slane %v406_v32, 1 }
 0x101   : > { %v408_v34 = vadd.f32 %v407_v33, %v406_v32 }
 0x103   : > { %v409_v35 = vmul.f32 0.015625, %v408_v34 }
 0x105   : > { %v410_v36 = vsub.f32 %v355_v15, %v409_v35  ;;  %v411_v37 = vsub.f32 %v1623_v14, %v409_v35  ;;  %v412_v38 = vsub.f32 %v365_v18, %v409_v35  ;;  %v413_v39 = vsub.f32 %v1626_v17, %v409_v35 }
 0x106   : > { %v414_v40 = vsub.f32 %v375_v22, %v409_v35  ;;  %v415_v41 = vsub.f32 %v1629_v20, %v409_v35  ;;  %v416_v42 = vsub.f32 %v385_v26, %v409_v35  ;;  %v417_v43 = vsub.f32 %v1632_v24, %v409_v35 }
 0x107   : > { %v418_v44 = vmul.f32 %v410_v36, %v410_v36  ;;  %v419_v45 = vmul.f32 %v411_v37, %v411_v37  ;;  %v420_v46 = vmul.f32 %v412_v38, %v412_v38  ;;  %v421_v48 = vmul.f32 %v413_v39, %v413_v39 }
 0x108   : > { %v422_v50 = vmul.f32 %v414_v40, %v414_v40  ;;  %v423_v52 = vmul.f32 %v415_v41, %v415_v41  ;;  %v424_v54 = vmul.f32 %v416_v42, %v416_v42  ;;  %v425_v56 = vmul.f32 %v417_v43, %v417_v43 }
 0x109   : > { %v426_v47 = vadd.f32 %v419_v45, %v418_v44 }
 0x10b   : > { %v427_v49 = vadd.f32 %v426_v47, %v420_v46 }
 0x10d   : > { %v428_v51 = vadd.f32 %v427_v49, %v421_v48 }
 0x10f   : > { %v429_v53 = vadd.f32 %v428_v51, %v422_v50 }
 0x111   : > { %v430_v55 = vadd.f32 %v429_v53, %v423_v52 }
 0x113   : > { %v431_v57 = vadd.f32 %v430_v55, %v424_v54 }
 0x115   : > { %v432_v58 = vadd.f32 %v431_v57, %v425_v56 }
 0x117   : > { %v433_v59 = vrot.slane %v432_v58, 4 }
 0x119   : > { %v434_v60 = vadd.f32 %v433_v59, %v432_v58 }
 0x11b   : > { %v435_v61 = vrot.slane %v434_v60, 2 }
 0x11d   : > { %v436_v62 = vadd.f32 %v435_v61, %v434_v60 }
 0x11f   : > { %v437_v63 = vrot.slane %v436_v62, 1 }
 0x121   : > { %v438_v0 = vadd.f32 %v437_v63, %v436_v62 }
 0x123   : > { %v439_v1 = vmul.f32 0.015625, %v438_v0 }
 0x125   : > { %v440_v2 = vadd.f32 1e-05, %v439_v1 }
 0x127   : > { %1824 = vrsqrt.f32 %v440_v2 }
 0x131   : > { %v1825_v7 = vpop.eup %1824 }
 0x132   : > { %v442_v8 = vmul.f32 %v1825_v7, %v394_v5 }
 0x134   : > { %v446_v9 = vrot.slane %v442_v8, %v1997_v6 }
 0x136   : > { %v449_v11 = vmul.f32 %v446_v9, %v412_v38  ;;  %v450_v12 = vmul.f32 %v446_v9, %v413_v39  ;;  %v451_v13 = vmul.f32 %v446_v9, %v414_v40  ;;  %v452_v14 = vmul.f32 %v446_v9, %v415_v41 }
 0x137   : > { %v453_v15 = vmul.f32 %v446_v9, %v416_v42  ;;  %v454_v16 = vmul.f32 %v446_v9, %v417_v43  ;;  %v447_v17 = vmul.f32 %v446_v9, %v410_v36  ;;  %v448_v18 = vmul.f32 %v446_v9, %v411_v37 }
 0x138   : > { %v464_v19 = vadd.f32 %v1519_v10, %v452_v14  ;;  %v463_v20 = vadd.f32 %v1519_v10, %v451_v13  ;;  %v461_v21 = vadd.f32 %v1519_v10, %v449_v11  ;;  %v462_v22 = vadd.f32 %v1519_v10, %v450_v12 }
 0x139   : > { %v465_v23 = vadd.f32 %v1519_v10, %v453_v15  ;;  %v466_v24 = vadd.f32 %v1519_v10, %v454_v16  ;;  %v459_v25 = vadd.f32 %v1519_v10, %v447_v17  ;;  %v460_v26 = vadd.f32 %v1519_v10, %v448_v18 }
 0x13a   : > { %v471_v27 = vmul.f32 0.1, %v463_v20  ;;  %v472_v28 = vmul.f32 0.1, %v464_v19  ;;  %v469_v29 = vmul.f32 0.1, %v461_v21 }
 0x13b   : > { %v473_v30 = vmul.f32 0.1, %v465_v23  ;;  %v474_v31 = vmul.f32 0.1, %v466_v24  ;;  %v467_v32 = vmul.f32 0.1, %v459_v25 }
 0x13c   : > { %v2003_v33 = vmax.f32 %v463_v20, %v471_v27  ;;  %v2005_v34 = vmax.f32 %v464_v19, %v472_v28  ;;  %v468_v35 = vmul.f32 0.1, %v460_v26  ;;  %v470_v36 = vmul.f32 0.1, %v462_v22 }
 0x13d   : > { %v2007_v37 = vmax.f32 %v459_v25, %v467_v32  ;;  %v2009_v38 = vmax.f32 %v465_v23, %v473_v30  ;;  %v2017_v41 = vmax.f32 %v466_v24, %v474_v31  ;;  %v2025_v43 = vmax.f32 %v461_v21, %v469_v29 }
 0x13e   : > { %v2013_v39 = vpack.i.bf16 %v2005_v34, %v2003_v33  ;;  %v2015_v40 = vmax.f32 %v460_v26, %v468_v35  ;;  %v2027_v44 = vmax.f32 %v462_v22, %v470_v36 }
 0x13f   : > { %1649 = vmatprep.mubr.msk.f32.mxu1 %vm264_vm0, %v2007_v37  ;;  %v2032_v45 = vpack.i.bf16 %v2017_v41, %v2009_v38 }
 0x140   : > { %1795 = vrot.lane.b32.xlu1 %v2013_v39, %s1910_s15  ;;  %v1784_v42 = vpack.i.bf16 %v2015_v40, %v2007_v37  ;;  %v2038_v46 = vpack.i.bf16 %v2027_v44, %v2025_v43 }
 0x142   : > { %1785 = vrot.lane.b32.xlu0 %v1784_v42, %s1910_s15 }
 0x144   : > { %1800 = vrot.lane.b32.xlu1 %v2032_v45, %s1910_s15 }
 0x146   : > { %1790 = vrot.lane.b32.xlu0 %v2038_v46, %s1910_s15 }
 0x1b2   : > { %v1796_v55 = vpop.permute.xlu1 %1795 }
 0x1b3   : > { %v1798_v57 = vunpack.i.h.bf16 %v1796_v55  ;;  %v1797_v58 = vunpack.i.l.bf16 %v1796_v55 }
 0x1b4   : > { %v1786_v47 = vpop.permute.xlu0 %1785 }
 0x1b5   : > { %v1788_v48 = vunpack.i.h.bf16 %v1786_v47  ;;  %v1787_v49 = vunpack.i.l.bf16 %v1786_v47  ;;  %v1729_v59 = vpack.c.bf16 %v1798_v57, %v1797_v58 }
 0x1b6   : > { %v1801_v60 = vpop.permute.xlu1 %1800 }
 0x1b7   : > { %v1717_v51 = vpack.c.bf16 %v1788_v48, %v1787_v49  ;;  %v1803_v61 = vunpack.i.h.bf16 %v1801_v60  ;;  %v1802_v62 = vunpack.i.l.bf16 %v1801_v60 }
 0x1b8   : > { %v1791_v52 = vpop.permute.xlu0 %1790 }
 0x1b9   : > { %v1793_v53 = vunpack.i.h.bf16 %v1791_v52  ;;  %v1792_v54 = vunpack.i.l.bf16 %v1791_v52  ;;  %1719 = vmatprep.subr.msk.bf16.mxu1 %vm2044_vm1, %v1717_v51  ;;  %v1735_v63 = vpack.c.bf16 %v1803_v61, %v1802_v62 }
 0x1ba   : > { %1722 = vmatpush3.bf16.xpose.msk.msra.mxu1 %vm2044_vm1, %v1717_v51 }
 0x1bb   : > { %v1723_v56 = vpack.c.bf16 %v1793_v53, %v1792_v54 }
 0x1bd   : > { %1725 = vmatprep.subr.msk.bf16.mxu1 %vm2044_vm1, %v1723_v56 }
 0x1c2   : > { %1728 = vmatpush3.bf16.xpose.msk.msra.mxu1 %vm2044_vm1, %v1723_v56 }
 0x1c3   : > { %1731 = vmatprep.subr.msk.bf16.mxu1 %vm2044_vm1, %v1729_v59 }
 0x1ca   : > { %1734 = vmatpush3.bf16.xpose.msk.msra.mxu1 %vm2044_vm1, %v1729_v59 }
 0x1cb   : > { %1737 = vmatprep.subr.msk.bf16.mxu1 %vm2044_vm1, %v1735_v63 }
 0x1d2   : > { %1740 = vmatpush3.bf16.xpose.msk.msra.mxu1 %vm2044_vm1, %v1735_v63 }
 0x1d9   : > { %1650 = vmatmul.mubr.msk.f32.vlgmr.msra.gmra.mrb[0].mxu1 %vm264_vm0, %v2015_v40 }
 0x1da   : > { %1652 = vmatprep.mubr.msk.f32.mxu1 %vm264_vm0, %v2025_v43 }
 0x1dd   : > { %1653 = vmatmul.mubr.msk.f32.gmra.mrb[2].mxu1 %vm264_vm0, %v2027_v44 }
 0x1de   : > { %1655 = vmatprep.mubr.msk.f32.mxu1 %vm264_vm0, %v2003_v33 }
 0x1e1   : > { %1656 = vmatmul.mubr.msk.f32.gmra.mrb[4].mxu1 %vm264_vm0, %v2005_v34 }
 0x1e2   : > { %1658 = vmatprep.mubr.msk.f32.mxu1 %vm264_vm0, %v2009_v38 }
 0x1e5   : > { %1659 = vmatmul.mubr.msk.f32.gmra.mrb[6].mxu1 %vm264_vm0, %v2017_v41 }
 0x2ac   : > { %v1651_v0 = vpop.f32.mrb[0].mxu1 }
 0x2ad   : > { %v605_v1 = vpop.f32.mrb[1].mxu1  ;;  %v648_v2 = vsel %vm644_vm2, %v1651_v0, -inf }
 0x2ae   : > { %649 = vmax.xlane.f32.xlu1 %v648_v2  ;;  %v645_v3 = vsel %vm644_vm2, %v605_v1, -inf }
 0x2af   : > { %646 = vmax.xlane.f32.xlu0 %v645_v3 }
 0x2b0   : > { %v1654_v4 = vpop.f32.mrb[2].mxu1 }
 0x2b1   : > { %v615_v5 = vpop.f32.mrb[3].mxu1  ;;  %v654_v10 = vsel %vm644_vm2, %v1654_v4, -inf }
 0x2b2   : > { %v651_v7 = vsel %vm644_vm2, %v615_v5, -inf }
 0x2b3   : > { %652 = vmax.xlane.f32.xlu0 %v651_v7 }
 0x2b4   : > { %v1657_v8 = vpop.f32.mrb[4].mxu1 }
 0x2b5   : > { %v625_v9 = vpop.f32.mrb[5].mxu1  ;;  %v660_v14 = vsel %vm644_vm2, %v1657_v8, -inf }
 0x2b6   : > { %v657_v11 = vsel %vm644_vm2, %v625_v9, -inf }
 0x2b7   : > { %655 = vmax.xlane.f32.xlu0 %v654_v10  ;;  %658 = vmax.xlane.f32.xlu1 %v657_v11 }
 0x2b8   : > { %v2083_v12 = vpop.f32.mrb[6].mxu1 }
 0x2b9   : > { %v2085_v13 = vpop.f32.mrb[7].mxu1 }
 0x2ba   : > { %v663_v60 = vsel %vm644_vm2, %v2085_v13, -inf }
 0x2bb   : > { %661 = vmax.xlane.f32.xlu0 %v660_v14 }
 0x2c8   : > { %1805 = vrot.lane.b32.xlu1 %v1784_v42, %s1911_s16 }
 0x33b   : > { %v650_v15 = vpop.xlane.xlu1 %649 }
 0x33c   : > { %v670_v16 = vsub.f32 %v1651_v0, %v650_v15  ;;  %v647_v17 = vpop.xlane.xlu0 %646  ;;  %v886_v15 = vld [vmem:[%s2341_s3] sm:$0xff] }
 0x33d   : > { %v669_v18 = vsub.f32 %v605_v1, %v647_v17 }
 0x33e   : > { %v679_v19 = vmul.f32 1.442695, %v670_v16  ;;  %v887_v16 = vld [vmem:[%s2341_s3 + $0x8] sm:$0xff] }
 0x33f   : > { %v677_v20 = vmul.f32 1.442695, %v669_v18 }
 0x340   : > { %1826 = vpow2.f32 %v679_v19  ;;  %v653_v21 = vpop.xlane.xlu0 %652 }
 0x341   : > { %1828 = vpow2.f32 %v677_v20  ;;  %v671_v22 = vsub.f32 %v615_v5, %v653_v21  ;;  %v1757_v20 = vpack.c.bf16 %v887_v16, %v886_v15 }
 0x343   : > { %v681_v23 = vmul.f32 1.442695, %v671_v22 }
 0x344   : > { %v656_v24 = vpop.xlane.xlu0 %655  ;;  %v659_v25 = vpop.xlane.xlu1 %658 }
 0x345   : > { %1830 = vpow2.f32 %v681_v23  ;;  %v672_v26 = vsub.f32 %v1654_v4, %v656_v24  ;;  %v673_v56 = vsub.f32 %v625_v9, %v659_v25  ;;  %v888_v23 = vld [vmem:[%s2341_s3 + $0x10] sm:$0xff]  ;;  %v889_v24 = vld [vmem:[%s2341_s3 + $0x18] sm:$0xff] }
 0x347   : > { %v683_v27 = vmul.f32 1.442695, %v672_v26  ;;  %v685_v57 = vmul.f32 1.442695, %v673_v56 }
 0x348   : > { %v662_v28 = vpop.xlane.xlu0 %661  ;;  %v1806_v29 = vpop.permute.xlu1 %1805 }
 0x349   : > { %1832 = vpow2.f32 %v683_v27  ;;  %v674_v30 = vsub.f32 %v1657_v8, %v662_v28  ;;  %v1808_v31 = vunpack.i.h.bf16 %v1806_v29  ;;  %v1807_v32 = vunpack.i.l.bf16 %v1806_v29 }
 0x34a   : > { %v2089_v35 = vpop.eup %1826  ;;  %v1761_v29 = vpack.c.bf16 %v889_v24, %v888_v23 }
 0x34b   : > { %v1829_v36 = vpop.eup %1828  ;;  %v687_v42 = vmul.f32 1.442695, %v674_v30  ;;  %v1741_v47 = vpack.c.bf16 %v1808_v31, %v1807_v32  ;;  %v696_v48 = vsel %vm644_vm2, %v2089_v35, 0.0 }
 0x34c   : > { %697 = vadd.xlane.f32.xlu0 %v696_v48  ;;  %v693_v49 = vsel %vm644_vm2, %v1829_v36, 0.0 }
 0x34d   : > { %1834 = vpow2.f32 %v687_v42  ;;  %694 = vadd.xlane.f32.xlu1 %v693_v49  ;;  %1742 = vmatprep.subr.bf16.mxu0 %v1741_v47 }
 0x34e   : > { %1765 = vmatprep.subr.bf16.mxu1 %v1741_v47  ;;  %1744 = vmatpush3.bf16.msra.mxu0 %v1741_v47  ;;  %1836 = vpow2.f32 %v685_v57 }
 0x34f   : > { %v2094_v50 = vpop.eup %1830  ;;  %1769 = vmatpush3.bf16.msra.mxu1 %v1741_v47 }
 0x350   : > { %v699_v51 = vsel %vm644_vm2, %v2094_v50, 0.0 }
 0x351   : > { %700 = vadd.xlane.f32.xlu1 %v699_v51 }
 0x353   : > { %v2098_v52 = vpop.eup %1832 }
 0x354   : > { %v702_v53 = vsel %vm644_vm2, %v2098_v52, 0.0 }
 0x355   : > { %703 = vadd.xlane.f32.xlu0 %v702_v53 }
 0x357   : > { %v2102_v54 = vpop.eup %1834 }
 0x358   : > { %v708_v55 = vsel %vm644_vm2, %v2102_v54, 0.0  ;;  %v2110_v58 = vpop.eup %1836 }
 0x359   : > { %709 = vadd.xlane.f32.xlu0 %v708_v55  ;;  %v705_v59 = vsel %vm644_vm2, %v2110_v58, 0.0 }
 0x362   : > { %1815 = vrot.lane.b32.xlu1 %v2013_v39, %s1911_s16  ;;  %v666_v39 = vsel %vm644_vm2, %v2083_v12, -inf }
 0x36f   : > { %1810 = vrot.lane.b32.xlu0 %v2038_v46, %s1911_s16 }
 0x386   : > { %706 = vadd.xlane.f32.xlu1 %v705_v59 }
 0x38e   : > { %664 = vmax.xlane.f32.xlu0 %v663_v60 }
 0x397   : > { %1820 = vrot.lane.b32.xlu1 %v2032_v45, %s1911_s16 }
 0x3bb   : > { %667 = vmax.xlane.f32.xlu1 %v666_v39 }
 0x3d9   : > { %v698_v61 = vpop.xlane.xlu0 %697 }
 0x3da   : > { %v695_v46 = vpop.xlane.xlu1 %694 }
 0x3db   : > { %1838 = vrcp.f32 %v695_v46 }
 0x3dc   : > { %1840 = vrcp.f32 %v698_v61 }
 0x3de   : > { %v701_v62 = vpop.xlane.xlu1 %700 }
 0x3df   : > { %1842 = vrcp.f32 %v701_v62 }
 0x3e2   : > { %v704_v63 = vpop.xlane.xlu0 %703  ;;  %v1816_v3 = vpop.permute.xlu1 %1815 }
 0x3e3   : > { %v1818_v5 = vunpack.i.h.bf16 %v1816_v3  ;;  %v1817_v7 = vunpack.i.l.bf16 %v1816_v3  ;;  %1844 = vrcp.f32 %v704_v63 }
 0x3e5   : > { %v1839_v0 = vpop.eup %1838  ;;  %v1749_v10 = vpack.c.bf16 %v1818_v5, %v1817_v7 }
 0x3e6   : > { %v710_v1 = vpop.xlane.xlu0 %709  ;;  %v725_v2 = vmul.f32 %v1839_v0, %v1829_v36  ;;  %v1841_v21 = vpop.eup %1840 }
 0x3e7   : > { %v726_v27 = vmul.f32 %v1841_v21, %v2089_v35 }
 0x3e8   : > { %1677 = vmatprep.mubr.msk.f32.mxu0 %vm644_vm2, %v725_v2 }
 0x3e9   : > { %v1843_v25 = vpop.eup %1842 }
 0x3ea   : > { %v1811_v4 = vpop.permute.xlu0 %1810  ;;  %v727_v31 = vmul.f32 %v1843_v25, %v2094_v50 }
 0x3eb   : > { %v1813_v8 = vunpack.i.h.bf16 %v1811_v4  ;;  %v1812_v45 = vunpack.i.l.bf16 %v1811_v4 }
 0x3ed   : > { %v1745_v9 = vpack.c.bf16 %v1813_v8, %v1812_v45  ;;  %v1845_v30 = vpop.eup %1844 }
 0x3ef   : > { %1746 = vmatprep.subr.bf16.mxu0 %v1745_v9  ;;  %1766 = vmatprep.subr.bf16.mxu1 %v1745_v9 }
 0x3f0   : > { %1748 = vmatpush3.bf16.msra.mxu0 %v1745_v9  ;;  %1770 = vmatpush3.bf16.msra.mxu1 %v1745_v9 }
 0x3f1   : > { %1750 = vmatprep.subr.bf16.mxu0 %v1749_v10  ;;  %1767 = vmatprep.subr.bf16.mxu1 %v1749_v10 }
 0x3f4   : > { %1752 = vmatpush3.bf16.msra.mxu0 %v1749_v10  ;;  %1771 = vmatpush3.bf16.msra.mxu1 %v1749_v10 }
 0x413   : > { %v707_v11 = vpop.xlane.xlu1 %706 }
 0x414   : > { %1846 = vrcp.f32 %v707_v11 }
 0x415   : > { %1848 = vrcp.f32 %v710_v1 }
 0x417   : > { %v1821_v14 = vpop.permute.xlu1 %1820 }
 0x418   : > { %v1823_v17 = vunpack.i.h.bf16 %v1821_v14  ;;  %v1822_v18 = vunpack.i.l.bf16 %v1821_v14 }
 0x41a   : > { %v1753_v19 = vpack.c.bf16 %v1823_v17, %v1822_v18 }
 0x41b   : > { %v665_v22 = vpop.xlane.xlu0 %664 }
 0x41c   : > { %v675_v26 = vsub.f32 %v2085_v13, %v665_v22  ;;  %1754 = vmatprep.subr.bf16.mxu0 %v1753_v19  ;;  %1768 = vmatprep.subr.bf16.mxu1 %v1753_v19  ;;  %v728_v13 = vmul.f32 %v1845_v30, %v2098_v52 }
 0x41d   : > { %1756 = vmatpush3.bf16.msra.mxu0 %v1753_v19  ;;  %1772 = vmatpush3.bf16.msra.mxu1 %v1753_v19 }
 0x41e   : > { %v689_v28 = vmul.f32 1.442695, %v675_v26  ;;  %1758 = vmatprep.subr.bf16.mxu0 %v1757_v20  ;;  %v1847_v32 = vpop.eup %1846 }
 0x41f   : > { %v1849_v36 = vpop.eup %1848  ;;  %v729_v42 = vmul.f32 %v1847_v32, %v2110_v58 }
 0x420   : > { %1850 = vpow2.f32 %v689_v28  ;;  %1678 = vmatmul.mubr.msk.f32.vlgmr.msra.gmra.mrb[8].mxu0 %vm644_vm2, %v726_v27  ;;  %v730_v35 = vmul.f32 %v1849_v36, %v2102_v54 }
 0x421   : > { %1680 = vmatprep.mubr.msk.f32.mxu0 %vm644_vm2, %v727_v31  ;;  %1760 = vmatpush3.bf16.msra.mxu0 %v1757_v20 }
 0x422   : > { %1762 = vmatprep.subr.bf16.mxu0 %v1761_v29 }
 0x424   : > { %1681 = vmatmul.mubr.msk.f32.gmra.mrb[10].mxu0 %vm644_vm2, %v728_v13 }
 0x425   : > { %1683 = vmatprep.mubr.msk.f32.mxu0 %vm644_vm2, %v729_v42  ;;  %1764 = vmatpush3.bf16.msra.mxu0 %v1761_v29 }
 0x428   : > { %1684 = vmatmul.mubr.msk.f32.gmra.mrb[12].mxu0 %vm644_vm2, %v730_v35 }
 0x429   : > { %1697 = vmatprep.mubr.msk.f32.mxu0 %vm264_vm0, %v2007_v37 }
 0x42a   : > { %v1851_v47 = vpop.eup %1850 }
 0x42b   : > { %v711_v48 = vsel %vm644_vm2, %v1851_v47, 0.0 }
 0x42c   : > { %1698 = vmatmul.mubr.msk.f32.vlgmr.msra.gmra.mrb[14].mxu0 %vm264_vm0, %v2015_v40  ;;  %712 = vadd.xlane.f32.xlu0 %v711_v48 }
 0x42d   : > { %1700 = vmatprep.mubr.msk.f32.mxu0 %vm264_vm0, %v2025_v43 }
 0x430   : > { %1701 = vmatmul.mubr.msk.f32.gmra.mrb[16].mxu0 %vm264_vm0, %v2027_v44 }
 0x431   : > { %1703 = vmatprep.mubr.msk.f32.mxu0 %vm264_vm0, %v2003_v33 }
 0x434   : > { %1704 = vmatmul.mubr.msk.f32.gmra.mrb[18].mxu0 %vm264_vm0, %v2005_v34 }
 0x435   : > { %1706 = vmatprep.mubr.msk.f32.mxu0 %vm264_vm0, %v2009_v38 }
 0x438   : > { %1707 = vmatmul.mubr.msk.f32.gmra.mrb[20].mxu0 %vm264_vm0, %v2017_v41 }
 0x448   : > { %v668_v49 = vpop.xlane.xlu1 %667 }
 0x449   : > { %v676_v50 = vsub.f32 %v2083_v12, %v668_v49 }
 0x44b   : > { %v691_v51 = vmul.f32 1.442695, %v676_v50 }
 0x44d   : > { %1852 = vpow2.f32 %v691_v51 }
 0x457   : > { %v1853_v52 = vpop.eup %1852 }
 0x458   : > { %v714_v53 = vsel %vm644_vm2, %v1853_v52, 0.0 }
 0x459   : > { %715 = vadd.xlane.f32.xlu0 %v714_v53 }
 0x4b9   : > { %v713_v54 = vpop.xlane.xlu0 %712 }
 0x4ba   : > { %1854 = vrcp.f32 %v713_v54 }
 0x4c4   : > { %v1855_v55 = vpop.eup %1854 }
 0x4c5   : > { %v731_v56 = vmul.f32 %v1855_v55, %v1851_v47 }
 0x4c7   : > { %1686 = vmatprep.mubr.msk.f32.mxu1 %vm644_vm2, %v731_v56 }
 0x4e6   : > { %v716_v57 = vpop.xlane.xlu0 %715 }
 0x4e7   : > { %1856 = vrcp.f32 %v716_v57 }
 0x4f1   : > { %v1857_v58 = vpop.eup %1856 }
 0x4f2   : > { %v732_v59 = vmul.f32 %v1857_v58, %v1853_v52 }
 0x4f3   : > { %v2164_v60 = vpop.f32.mrb[8].mxu0 }
 0x4f4   : > { %v2166_v39 = vpop.f32.mrb[9].mxu0  ;;  %1687 = vmatmul.mubr.msk.f32.vlgmr.msra.gmra.mrb[8].mxu1 %vm644_vm2, %v732_v59 }
 0x4f7   : > { %v2169_v12 = vpop.f32.mrb[10].mxu0 }
 0x4f8   : > { %v2171_v46 = vpop.f32.mrb[11].mxu0 }
 0x4fb   : > { %v2173_v61 = vpop.f32.mrb[12].mxu0 }
 0x4fc   : > { %v2175_v62 = vpop.f32.mrb[13].mxu0 }
 0x4ff   : > { %v1699_v63 = vpop.f32.mrb[14].mxu0 }
 0x500   : > { %v998_v0 = vsel %vm264_vm0, %v1699_v63, 0.0  ;;  %v956_v1 = vpop.f32.mrb[15].mxu0 }
 0x501   : > { %v997_v2 = vsel %vm264_vm0, %v956_v1, 0.0 }
 0x502   : > { %v999_v3 = vadd.f32 %v998_v0, %v997_v2 }
 0x503   : > { %v1702_v4 = vpop.f32.mrb[16].mxu0 }
 0x504   : > { %v966_v5 = vpop.f32.mrb[17].mxu0  ;;  %v1002_v45 = vsel %vm264_vm0, %v1702_v4, 0.0 }
 0x505   : > { %v1000_v7 = vsel %vm264_vm0, %v966_v5, 0.0 }
 0x506   : > { %v1001_v8 = vadd.f32 %v1000_v7, %v999_v3 }
 0x507   : > { %v1705_v9 = vpop.f32.mrb[18].mxu0 }
 0x508   : > { %v976_v10 = vpop.f32.mrb[19].mxu0  ;;  %v1003_v11 = vadd.f32 %v1002_v45, %v1001_v8  ;;  %v1006_v16 = vsel %vm264_vm0, %v1705_v9, 0.0 }
 0x509   : > { %v1004_v14 = vsel %vm264_vm0, %v976_v10, 0.0 }
 0x50a   : > { %v1005_v15 = vadd.f32 %v1004_v14, %v1003_v11 }
 0x50b   : > { %v1708_v17 = vpop.f32.mrb[20].mxu0 }
 0x50c   : > { %v986_v18 = vpop.f32.mrb[21].mxu0  ;;  %v1007_v19 = vadd.f32 %v1006_v16, %v1005_v15  ;;  %v1010_v22 = vsel %vm264_vm0, %v1708_v17, 0.0 }
 0x50d   : > { %v1008_v20 = vsel %vm264_vm0, %v986_v18, 0.0 }
 0x50e   : > { %v1009_v21 = vadd.f32 %v1008_v20, %v1007_v19 }
 0x510   : > { %v1011_v23 = vadd.f32 %v1010_v22, %v1009_v21  ;;  %v995_v21 = vld [vmem:[%s2342_s4] sm:$0x1] }
 0x512   : > { %v1012_v24 = vrot.slane %v1011_v23, 4 }
 0x514   : > { %v1013_v25 = vadd.f32 %v1012_v24, %v1011_v23 }
 0x516   : > { %v1014_v26 = vrot.slane %v1013_v25, 2 }
 0x518   : > { %v1015_v27 = vadd.f32 %v1014_v26, %v1013_v25  ;;  %v1552_v25 = vld [vmem:[%s2342_s4 + $0x1] ss:$0 sm:$0xff] }
 0x51a   : > { %v1016_v28 = vrot.slane %v1015_v27, 1 }
 0x51c   : > { %v1017_v29 = vadd.f32 %v1016_v28, %v1015_v27 }
 0x51e   : > { %v1018_v30 = vmul.f32 0.015625, %v1017_v29 }
 0x520   : > { %v1019_v31 = vsub.f32 %v956_v1, %v1018_v30  ;;  %v1020_v32 = vsub.f32 %v1699_v63, %v1018_v30  ;;  %v1021_v13 = vsub.f32 %v966_v5, %v1018_v30  ;;  %v1022_v36 = vsub.f32 %v1702_v4, %v1018_v30 }
 0x521   : > { %v1023_v42 = vsub.f32 %v976_v10, %v1018_v30  ;;  %v1024_v35 = vsub.f32 %v1705_v9, %v1018_v30  ;;  %v1025_v47 = vsub.f32 %v986_v18, %v1018_v30  ;;  %v1026_v48 = vsub.f32 %v1708_v17, %v1018_v30 }
 0x522   : > { %v1027_v49 = vmul.f32 %v1019_v31, %v1019_v31  ;;  %v1028_v50 = vmul.f32 %v1020_v32, %v1020_v32  ;;  %v1029_v51 = vmul.f32 %v1021_v13, %v1021_v13  ;;  %v1030_v52 = vmul.f32 %v1022_v36, %v1022_v36 }
 0x523   : > { %v1031_v56 = vmul.f32 %v1023_v42, %v1023_v42  ;;  %v1032_v59 = vmul.f32 %v1024_v35, %v1024_v35  ;;  %v1033_v1 = vmul.f32 %v1025_v47, %v1025_v47  ;;  %v1034_v4 = vmul.f32 %v1026_v48, %v1026_v48 }
 0x524   : > { %v1035_v53 = vsel %vm264_vm0, %v1027_v49, 0.0  ;;  %v1036_v54 = vsel %vm264_vm0, %v1028_v50, 0.0  ;;  %v1038_v57 = vsel %vm264_vm0, %v1029_v51, 0.0  ;;  %v1040_v63 = vsel %vm264_vm0, %v1030_v52, 0.0 }
 0x525   : > { %v1037_v55 = vadd.f32 %v1036_v54, %v1035_v53  ;;  %v1042_v2 = vsel %vm264_vm0, %v1031_v56, 0.0  ;;  %v1044_v5 = vsel %vm264_vm0, %v1032_v59, 0.0  ;;  %v1046_v8 = vsel %vm264_vm0, %v1033_v1, 0.0 }
 0x526   : > { %v1048_v9 = vsel %vm264_vm0, %v1034_v4, 0.0 }
 0x527   : > { %v1039_v58 = vadd.f32 %v1038_v57, %v1037_v55 }
 0x529   : > { %v1041_v0 = vadd.f32 %v1040_v63, %v1039_v58 }
 0x52b   : > { %v1043_v3 = vadd.f32 %v1042_v2, %v1041_v0 }
 0x52d   : > { %v1045_v7 = vadd.f32 %v1044_v5, %v1043_v3 }
 0x52f   : > { %v1047_v45 = vadd.f32 %v1046_v8, %v1045_v7 }
 0x531   : > { %v1049_v10 = vadd.f32 %v1048_v9, %v1047_v45 }
 0x533   : > { %v1050_v11 = vrot.slane %v1049_v10, 4 }
 0x535   : > { %v1051_v14 = vadd.f32 %v1050_v11, %v1049_v10 }
 0x537   : > { %v1052_v15 = vrot.slane %v1051_v14, 2 }
 0x539   : > { %v1053_v16 = vadd.f32 %v1052_v15, %v1051_v14 }
 0x53b   : > { %v1054_v17 = vrot.slane %v1053_v16, 1 }
 0x53d   : > { %v1055_v18 = vadd.f32 %v1054_v17, %v1053_v16 }
 0x53f   : > { %v1056_v19 = vmul.f32 0.015625, %v1055_v18 }
 0x541   : > { %v1057_v20 = vadd.f32 1e-05, %v1056_v19 }
 0x543   : > { %1858 = vrsqrt.f32 %v1057_v20 }
 0x54d   : > { %v1859_v22 = vpop.eup %1858 }
 0x54e   : > { %v1059_v23 = vmul.f32 %v1859_v22, %v995_v21 }
 0x550   : > { %v1063_v24 = vrot.slane %v1059_v23, %v1997_v6 }
 0x552   : > { %v1070_v26 = vmul.f32 %v1063_v24, %v1025_v47  ;;  %v1064_v27 = vmul.f32 %v1063_v24, %v1019_v31  ;;  %v1065_v28 = vmul.f32 %v1063_v24, %v1020_v32  ;;  %v1066_v29 = vmul.f32 %v1063_v24, %v1021_v13 }
 0x553   : > { %v1067_v30 = vmul.f32 %v1063_v24, %v1022_v36  ;;  %v1068_v49 = vmul.f32 %v1063_v24, %v1023_v42  ;;  %v1069_v50 = vmul.f32 %v1063_v24, %v1024_v35  ;;  %v1071_v51 = vmul.f32 %v1063_v24, %v1026_v48 }
 0x554   : > { %v1076_v52 = vadd.f32 %v1552_v25, %v1064_v27  ;;  %v1077_v53 = vadd.f32 %v1552_v25, %v1065_v28  ;;  %v1078_v54 = vadd.f32 %v1552_v25, %v1066_v29  ;;  %v1082_v32 = vadd.f32 %v1552_v25, %v1070_v26 }
 0x555   : > { %v1079_v55 = vadd.f32 %v1552_v25, %v1067_v30  ;;  %v1080_v56 = vadd.f32 %v1552_v25, %v1068_v49  ;;  %v1081_v57 = vadd.f32 %v1552_v25, %v1069_v50  ;;  %v1083_v13 = vadd.f32 %v1552_v25, %v1071_v51 }
 0x556   : > { %v1084_v58 = vmul.f32 0.1, %v1076_v52  ;;  %v1085_v59 = vmul.f32 0.1, %v1077_v53  ;;  %v1086_v63 = vmul.f32 0.1, %v1078_v54 }
 0x557   : > { %v1087_v0 = vmul.f32 0.1, %v1079_v55  ;;  %v1088_v47 = vmul.f32 0.1, %v1080_v56  ;;  %v1089_v31 = vmul.f32 0.1, %v1081_v57 }
 0x558   : > { %v1092_v1 = vmax.f32 %v1076_v52, %v1084_v58  ;;  %v1093_v2 = vmax.f32 %v1077_v53, %v1085_v59  ;;  %v1094_v35 = vmax.f32 %v1078_v54, %v1086_v63  ;;  %v1090_v4 = vmul.f32 0.1, %v1082_v32 }
 0x559   : > { %v1095_v48 = vmax.f32 %v1079_v55, %v1087_v0  ;;  %v1096_v3 = vmax.f32 %v1080_v56, %v1088_v47  ;;  %v1097_v8 = vmax.f32 %v1081_v57, %v1089_v31  ;;  %v1091_v45 = vmul.f32 0.1, %v1083_v13 }
 0x55a   : > { %v1100_v36 = vsel %vm264_vm0, %v1092_v1, -inf  ;;  %v1103_v42 = vsel %vm264_vm0, %v1093_v2, -inf  ;;  %v1106_v5 = vsel %vm264_vm0, %v1094_v35, -inf  ;;  %v1098_v11 = vmax.f32 %v1082_v32, %v1090_v4 }
 0x55b   : > { %1101 = vmax.xlane.f32.xlu1 %v1100_v36  ;;  %1104 = vmax.xlane.f32.xlu0 %v1103_v42  ;;  %v1109_v7 = vsel %vm264_vm0, %v1095_v48, -inf  ;;  %v1112_v9 = vsel %vm264_vm0, %v1096_v3, -inf  ;;  %v1115_v10 = vsel %vm264_vm0, %v1097_v8, -inf  ;;  %v1099_v14 = vmax.f32 %v1083_v13, %v1091_v45 }
 0x55c   : > { %v1118_v15 = vsel %vm264_vm0, %v1098_v11, -inf }
 0x55d   : > { %v1121_v16 = vsel %vm264_vm0, %v1099_v14, -inf }
 0x55f   : > { %1107 = vmax.xlane.f32.xlu1 %v1106_v5  ;;  %1110 = vmax.xlane.f32.xlu0 %v1109_v7 }
 0x563   : > { %1113 = vmax.xlane.f32.xlu1 %v1112_v9  ;;  %1116 = vmax.xlane.f32.xlu0 %v1115_v10 }
 0x567   : > { %1119 = vmax.xlane.f32.xlu1 %v1118_v15  ;;  %1122 = vmax.xlane.f32.xlu0 %v1121_v16 }
 0x578   : > { %1188 = vrot.lane.b32.xlu1 %v2007_v37, %s1912_s8 }
 0x57c   : > { %1192 = vrot.lane.b32.xlu1 %v2025_v43, %s1912_s8 }
 0x57d   : > { %1190 = vrot.lane.b32.xlu0 %v2015_v40, %s1912_s8 }
 0x580   : > { %1194 = vrot.lane.b32.xlu1 %v2027_v44, %s1912_s8 }
 0x581   : > { %1196 = vrot.lane.b32.xlu0 %v2003_v33, %s1912_s8 }
 0x584   : > { %1198 = vrot.lane.b32.xlu1 %v2005_v34, %s1912_s8 }
 0x5c7   : > { %v2220_v17 = vpop.f32.mrb[8].mxu1 }
 0x5c8   : > { %v2222_v18 = vpop.f32.mrb[9].mxu1 }
 0x5e8   : > { %v1102_v37 = vpop.xlane.xlu1 %1101  ;;  %v1105_v19 = vpop.xlane.xlu0 %1104 }
 0x5e9   : > { %v1124_v20 = vsub.f32 %v1092_v1, %v1102_v37  ;;  %v1125_v43 = vsub.f32 %v1093_v2, %v1105_v19 }
 0x5eb   : > { %v1132_v21 = vmul.f32 1.442695, %v1124_v20  ;;  %v1134_v22 = vmul.f32 1.442695, %v1125_v43 }
 0x5ec   : > { %v1108_v40 = vpop.xlane.xlu1 %1107  ;;  %v1111_v23 = vpop.xlane.xlu0 %1110 }
 0x5ed   : > { %1860 = vpow2.f32 %v1132_v21  ;;  %v1126_v44 = vsub.f32 %v1094_v35, %v1108_v40  ;;  %v1127_v24 = vsub.f32 %v1095_v48, %v1111_v23 }
 0x5ee   : > { %1862 = vpow2.f32 %v1134_v22 }
 0x5ef   : > { %v1136_v33 = vmul.f32 1.442695, %v1126_v44  ;;  %v1138_v25 = vmul.f32 1.442695, %v1127_v24 }
 0x5f0   : > { %v1114_v26 = vpop.xlane.xlu1 %1113  ;;  %v1117_v34 = vpop.xlane.xlu0 %1116 }
 0x5f1   : > { %1864 = vpow2.f32 %v1136_v33  ;;  %v1128_v27 = vsub.f32 %v1096_v3, %v1114_v26  ;;  %v1129_v28 = vsub.f32 %v1097_v8, %v1117_v34 }
 0x5f2   : > { %1866 = vpow2.f32 %v1138_v25 }
 0x5f3   : > { %v1140_v29 = vmul.f32 1.442695, %v1128_v27  ;;  %v1142_v30 = vmul.f32 1.442695, %v1129_v28 }
 0x5f4   : > { %v1120_v49 = vpop.xlane.xlu1 %1119  ;;  %v1123_v50 = vpop.xlane.xlu0 %1122 }
 0x5f5   : > { %1868 = vpow2.f32 %v1140_v29  ;;  %v1130_v51 = vsub.f32 %v1098_v11, %v1120_v49  ;;  %v1131_v52 = vsub.f32 %v1099_v14, %v1123_v50 }
 0x5f6   : > { %1870 = vpow2.f32 %v1142_v30 }
 0x5f7   : > { %v1861_v53 = vpop.eup %1860  ;;  %v1144_v54 = vmul.f32 1.442695, %v1130_v51  ;;  %v1146_v55 = vmul.f32 1.442695, %v1131_v52 }
 0x5f8   : > { %v1863_v56 = vpop.eup %1862  ;;  %v1148_v57 = vsel %vm264_vm0, %v1861_v53, 0.0  ;;  %v1189_v48 = vpop.permute.xlu1 %1188 }
 0x5f9   : > { %1872 = vpow2.f32 %v1144_v54  ;;  %1149 = vadd.xlane.f32.xlu1 %v1148_v57  ;;  %v1151_v58 = vsel %vm264_vm0, %v1863_v56, 0.0  ;;  %v1191_v5 = vpop.permute.xlu0 %1190  ;;  %v2252_v57 = vld [vmem:[%s2343_s5 + $0x1] sm:$0x1] }
 0x5fa   : > { %1874 = vpow2.f32 %v1146_v55  ;;  %1152 = vadd.xlane.f32.xlu0 %v1151_v58 }
 0x5fb   : > { %v1865_v59 = vpop.eup %1864 }
 0x5fc   : > { %v1867_v63 = vpop.eup %1866  ;;  %v1154_v0 = vsel %vm264_vm0, %v1865_v59, 0.0  ;;  %v1193_v3 = vpop.permute.xlu1 %1192 }
 0x5fd   : > { %1155 = vadd.xlane.f32.xlu1 %v1154_v0  ;;  %v1157_v1 = vsel %vm264_vm0, %v1867_v63, 0.0  ;;  %v1197_v8 = vpop.permute.xlu0 %1196 }
 0x5fe   : > { %1158 = vadd.xlane.f32.xlu0 %v1157_v1 }
 0x5ff   : > { %v1869_v2 = vpop.eup %1868 }
 0x600   : > { %v1871_v47 = vpop.eup %1870  ;;  %v1160_v31 = vsel %vm264_vm0, %v1869_v2, 0.0  ;;  %v1195_v4 = vpop.permute.xlu1 %1194 }
 0x601   : > { %1161 = vadd.xlane.f32.xlu1 %v1160_v31  ;;  %v1163_v32 = vsel %vm264_vm0, %v1871_v47, 0.0 }
 0x602   : > { %1164 = vadd.xlane.f32.xlu0 %v1163_v32 }
 0x603   : > { %v1873_v13 = vpop.eup %1872 }
 0x604   : > { %v1875_v36 = vpop.eup %1874  ;;  %v1166_v42 = vsel %vm264_vm0, %v1873_v13, 0.0  ;;  %v1199_v7 = vpop.permute.xlu1 %1198 }
 0x605   : > { %1167 = vadd.xlane.f32.xlu1 %v1166_v42  ;;  %v1169_v35 = vsel %vm264_vm0, %v1875_v36, 0.0 }
 0x606   : > { %1170 = vadd.xlane.f32.xlu0 %v1169_v35 }
 0x616   : > { %1202 = vrot.lane.b32.xlu1 %v2017_v41, %s1912_s8 }
 0x61c   : > { %1200 = vrot.lane.b32.xlu0 %v2009_v38, %s1912_s8 }
 0x686   : > { %v1150_v45 = vpop.xlane.xlu1 %1149 }
 0x687   : > { %1876 = vrcp.f32 %v1150_v45  ;;  %v1153_v9 = vpop.xlane.xlu0 %1152 }
 0x688   : > { %1878 = vrcp.f32 %v1153_v9 }
 0x68a   : > { %v1156_v10 = vpop.xlane.xlu1 %1155 }
 0x68b   : > { %1880 = vrcp.f32 %v1156_v10  ;;  %v1159_v11 = vpop.xlane.xlu0 %1158 }
 0x68c   : > { %1882 = vrcp.f32 %v1159_v11 }
 0x68e   : > { %v1162_v14 = vpop.xlane.xlu1 %1161 }
 0x68f   : > { %1884 = vrcp.f32 %v1162_v14  ;;  %v1165_v41 = vpop.xlane.xlu0 %1164 }
 0x690   : > { %1886 = vrcp.f32 %v1165_v41 }
 0x691   : > { %v1877_v15 = vpop.eup %1876 }
 0x692   : > { %v1879_v38 = vpop.eup %1878  ;;  %v1168_v16 = vpop.xlane.xlu1 %1167  ;;  %v1180_v37 = vmul.f32 %v1877_v15, %v1861_v53 }
 0x693   : > { %1888 = vrcp.f32 %v1168_v16  ;;  %v1171_v19 = vpop.xlane.xlu0 %1170  ;;  %v1181_v20 = vmul.f32 %v1879_v38, %v1863_v56  ;;  %v2247_v56 = vld [vmem:[%s2343_s5] sm:$0x1] }
 0x694   : > { %1890 = vrcp.f32 %v1171_v19  ;;  %v1212_v43 = vmul.f32 %v1189_v48, %v1180_v37 }
 0x695   : > { %v1881_v21 = vpop.eup %1880  ;;  %v1213_v22 = vmul.f32 %v1191_v5, %v1181_v20 }
 0x696   : > { %v1883_v40 = vpop.eup %1882  ;;  %1230 = vrot.lane.b32.xlu0 %v1212_v43, %s1912_s8  ;;  %v1182_v23 = vmul.f32 %v1881_v21, %v1865_v59  ;;  %v1203_v53 = vpop.permute.xlu1 %1202 }
 0x697   : > { %1232 = vrot.lane.b32.xlu1 %v1213_v22, %s1912_s8  ;;  %v1183_v44 = vmul.f32 %v1883_v40, %v1867_v63  ;;  %v1201_v52 = vpop.permute.xlu0 %1200 }
 0x698   : > { %v1214_v24 = vmul.f32 %v1193_v3, %v1182_v23 }
 0x699   : > { %v1885_v33 = vpop.eup %1884  ;;  %v1215_v25 = vmul.f32 %v1195_v4, %v1183_v44 }
 0x69a   : > { %v1887_v26 = vpop.eup %1886  ;;  %1234 = vrot.lane.b32.xlu0 %v1214_v24, %s1912_s8  ;;  %v1184_v34 = vmul.f32 %v1885_v33, %v1869_v2 }
 0x69b   : > { %1236 = vrot.lane.b32.xlu1 %v1215_v25, %s1912_s8  ;;  %v1185_v27 = vmul.f32 %v1887_v26, %v1871_v47 }
 0x69c   : > { %v1216_v28 = vmul.f32 %v1197_v8, %v1184_v34 }
 0x69d   : > { %v1889_v29 = vpop.eup %1888  ;;  %v1217_v30 = vmul.f32 %v1199_v7, %v1185_v27 }
 0x69e   : > { %v1891_v49 = vpop.eup %1890  ;;  %v1186_v50 = vmul.f32 %v1889_v29, %v1873_v13  ;;  %1238 = vrot.lane.b32.xlu0 %v1216_v28, %s1912_s8 }
 0x69f   : > { %v1187_v51 = vmul.f32 %v1891_v49, %v1875_v36  ;;  %1240 = vrot.lane.b32.xlu1 %v1217_v30, %s1912_s8 }
 0x6a0   : > { %v1218_v54 = vmul.f32 %v1201_v52, %v1186_v50 }
 0x6a1   : > { %v1219_v55 = vmul.f32 %v1203_v53, %v1187_v51 }
 0x6a2   : > { %1242 = vrot.lane.b32.xlu0 %v1218_v54, %s1912_s8 }
 0x6a3   : > { %1244 = vrot.lane.b32.xlu1 %v1219_v55, %s1912_s8 }
 0x6a6   : > { %1263 = vrot.lane.b32.xlu0 %v2247_v56, %s1912_s8 }
 0x6a7   : > { %1268 = vrot.lane.b32.xlu1 %v2252_v57, %s1912_s8 }
 0x708   : > { %v1231_v58 = vpop.permute.xlu0 %1230 }
 0x709   : > { %v1233_v59 = vpop.permute.xlu1 %1232  ;;  %v1254_v63 = vsel %vm264_vm0, %v2166_v39, %v1231_v58 }
 0x70a   : > { %v1255_v0 = vsel %vm264_vm0, %v2164_v60, %v1233_v59  ;;  %v1272_v1 = vsel %vm644_vm2, %v1254_v63, 0.0 }
 0x70b   : > { %v1273_v2 = vsel %vm644_vm2, %v1255_v0, 0.0 }
 0x70c   : > { %v1274_v47 = vadd.f32 %v1273_v2, %v1272_v1  ;;  %v1235_v31 = vpop.permute.xlu0 %1234 }
 0x70d   : > { %v1237_v32 = vpop.permute.xlu1 %1236  ;;  %v1256_v13 = vsel %vm264_vm0, %v2171_v46, %v1235_v31 }
 0x70e   : > { %v1257_v36 = vsel %vm264_vm0, %v2169_v12, %v1237_v32  ;;  %v1275_v42 = vsel %vm644_vm2, %v1256_v13, 0.0 }
 0x70f   : > { %v1276_v35 = vadd.f32 %v1275_v42, %v1274_v47  ;;  %v1277_v39 = vsel %vm644_vm2, %v1257_v36, 0.0 }
 0x710   : > { %v1239_v48 = vpop.permute.xlu0 %1238 }
 0x711   : > { %v1241_v60 = vpop.permute.xlu1 %1240  ;;  %v1278_v3 = vadd.f32 %v1277_v39, %v1276_v35  ;;  %v1258_v4 = vsel %vm264_vm0, %v2175_v62, %v1239_v48 }
 0x712   : > { %v1259_v5 = vsel %vm264_vm0, %v2173_v61, %v1241_v60  ;;  %v1279_v7 = vsel %vm644_vm2, %v1258_v4, 0.0 }
 0x713   : > { %v1280_v46 = vadd.f32 %v1279_v7, %v1278_v3  ;;  %v1281_v8 = vsel %vm644_vm2, %v1259_v5, 0.0 }
 0x714   : > { %v1243_v12 = vpop.permute.xlu0 %1242 }
 0x715   : > { %v1245_v45 = vpop.permute.xlu1 %1244  ;;  %v1282_v9 = vadd.f32 %v1281_v8, %v1280_v46  ;;  %v1260_v10 = vsel %vm264_vm0, %v2222_v18, %v1243_v12 }
 0x716   : > { %v1261_v11 = vsel %vm264_vm0, %v2220_v17, %v1245_v45  ;;  %v1283_v14 = vsel %vm644_vm2, %v1260_v10, 0.0 }
 0x717   : > { %v1284_v62 = vadd.f32 %v1283_v14, %v1282_v9  ;;  %v1285_v41 = vsel %vm644_vm2, %v1261_v11, 0.0 }
 0x718   : > { %v1264_v3 = vpop.permute.xlu0 %1263 }
 0x719   : > { %v1286_v61 = vadd.f32 %v1285_v41, %v1284_v62 }
 0x71b   : > { %v1287_v15 = vrot.slane %v1286_v61, 4 }
 0x71d   : > { %v1288_v38 = vadd.f32 %v1287_v15, %v1286_v61 }
 0x71f   : > { %v1289_v16 = vrot.slane %v1288_v38, 2 }
 0x721   : > { %v1290_v37 = vadd.f32 %v1289_v16, %v1288_v38 }
 0x723   : > { %v1291_v19 = vrot.slane %v1290_v37, 1 }
 0x725   : > { %v1292_v20 = vadd.f32 %v1291_v19, %v1290_v37 }
 0x727   : > { %v1293_v43 = vmul.f32 0.015625, %v1292_v20 }
 0x729   : > { %v1294_v21 = vsub.f32 %v1254_v63, %v1293_v43  ;;  %v1295_v22 = vsub.f32 %v1255_v0, %v1293_v43  ;;  %v1296_v40 = vsub.f32 %v1256_v13, %v1293_v43  ;;  %v1297_v18 = vsub.f32 %v1257_v36, %v1293_v43 }
 0x72a   : > { %v1298_v23 = vsub.f32 %v1258_v4, %v1293_v43  ;;  %v1299_v44 = vsub.f32 %v1259_v5, %v1293_v43  ;;  %v1300_v17 = vsub.f32 %v1260_v10, %v1293_v43  ;;  %v1301_v24 = vsub.f32 %v1261_v11, %v1293_v43  ;;  %v1269_v4 = vpop.permute.xlu1 %1268 }
 0x72b   : > { %v1302_v33 = vmul.f32 %v1294_v21, %v1294_v21  ;;  %v1303_v25 = vmul.f32 %v1295_v22, %v1295_v22  ;;  %v1304_v26 = vmul.f32 %v1296_v40, %v1296_v40  ;;  %v1305_v34 = vmul.f32 %v1297_v18, %v1297_v18 }
 0x72c   : > { %v1306_v30 = vmul.f32 %v1298_v23, %v1298_v23  ;;  %v1307_v51 = vmul.f32 %v1299_v44, %v1299_v44  ;;  %v1308_v54 = vmul.f32 %v1300_v17, %v1300_v17  ;;  %v1309_v59 = vmul.f32 %v1301_v24, %v1301_v24 }
 0x72d   : > { %v1310_v27 = vsel %vm644_vm2, %v1302_v33, 0.0  ;;  %v1311_v28 = vsel %vm644_vm2, %v1303_v25, 0.0  ;;  %v1313_v49 = vsel %vm644_vm2, %v1304_v26, 0.0  ;;  %v1315_v52 = vsel %vm644_vm2, %v1305_v34, 0.0 }
 0x72e   : > { %v1312_v29 = vadd.f32 %v1311_v28, %v1310_v27  ;;  %v1317_v55 = vsel %vm644_vm2, %v1306_v30, 0.0  ;;  %v1319_v63 = vsel %vm644_vm2, %v1307_v51, 0.0  ;;  %v1321_v1 = vsel %vm644_vm2, %v1308_v54, 0.0  ;;  %v1894_v30 = vld [vmem:[%s1976_s10 + $0x8] sm:$0xff] }
 0x72f   : > { %v1323_v47 = vsel %vm644_vm2, %v1309_v59, 0.0  ;;  %v1266_v5 = vsel %vm264_vm0, %v2247_v56, %v1264_v3  ;;  %v1271_v46 = vsel %vm264_vm0, %v2252_v57, %v1269_v4  ;;  %v1899_v3 = vld [vmem:[%s1976_s10 + $0x20] sm:$0xff] }
 0x730   : > { %v1314_v50 = vadd.f32 %v1313_v49, %v1312_v29  ;;  %v1350_v45 = vrot.slane %v1271_v46, %v1997_v6 }
 0x732   : > { %v1316_v53 = vadd.f32 %v1315_v52, %v1314_v50  ;;  %v1895_v50 = vld [vmem:[%s1976_s10] sm:$0xff] }
 0x734   : > { %v1318_v58 = vadd.f32 %v1317_v55, %v1316_v53 }
 0x736   : > { %v1320_v0 = vadd.f32 %v1319_v63, %v1318_v58  ;;  %v1896_v63 = vld [vmem:[%s1976_s10 + $0x18] sm:$0xff] }
 0x738   : > { %v1322_v2 = vadd.f32 %v1321_v1, %v1320_v0  ;;  %v1897_v1 = vld [vmem:[%s1976_s10 + $0x10] sm:$0xff] }
 0x73a   : > { %v1324_v31 = vadd.f32 %v1323_v47, %v1322_v2 }
 0x73c   : > { %v1325_v32 = vrot.slane %v1324_v31, 4 }
 0x73e   : > { %v1326_v13 = vadd.f32 %v1325_v32, %v1324_v31 }
 0x740   : > { %v1327_v36 = vrot.slane %v1326_v13, 2 }
 0x742   : > { %v1328_v42 = vadd.f32 %v1327_v36, %v1326_v13 }
 0x744   : > { %v1329_v35 = vrot.slane %v1328_v42, 1 }
 0x746   : > { %v1330_v39 = vadd.f32 %v1329_v35, %v1328_v42 }
 0x748   : > { %v1331_v48 = vmul.f32 0.015625, %v1330_v39 }
 0x74a   : > { %v1332_v60 = vadd.f32 1e-05, %v1331_v48  ;;  %v1898_v48 = vld [vmem:[%s1976_s10 + $0x28] sm:$0xff] }
 0x74c   : > { %1892 = vrsqrt.f32 %v1332_v60 }
 0x756   : > { %v1893_v7 = vpop.eup %1892 }
 0x757   : > { %v1334_v8 = vmul.f32 %v1893_v7, %v1266_v5 }
 0x759   : > { %v1338_v12 = vrot.slane %v1334_v8, %v1997_v6 }
 0x75b   : > { %v1340_v9 = vmul.f32 %v1338_v12, %v1295_v22  ;;  %v1339_v10 = vmul.f32 %v1338_v12, %v1294_v21  ;;  %v1342_v11 = vmul.f32 %v1338_v12, %v1297_v18  ;;  %v1341_v14 = vmul.f32 %v1338_v12, %v1296_v40 }
 0x75c   : > { %v1344_v62 = vmul.f32 %v1338_v12, %v1299_v44  ;;  %v1343_v41 = vmul.f32 %v1338_v12, %v1298_v23  ;;  %v1346_v61 = vmul.f32 %v1338_v12, %v1301_v24  ;;  %v1345_v15 = vmul.f32 %v1338_v12, %v1300_v17 }
 0x75d   : > { %v1352_v38 = vadd.f32 %v1350_v45, %v1340_v9  ;;  %v1351_v16 = vadd.f32 %v1350_v45, %v1339_v10  ;;  %v1354_v56 = vadd.f32 %v1350_v45, %v1342_v11  ;;  %v1353_v37 = vadd.f32 %v1350_v45, %v1341_v14  ;;  %v1900_v11 = vld [vmem:[%s1976_s10 + $0x38] sm:$0xff] }
 0x75e   : > { %v1356_v57 = vadd.f32 %v1350_v45, %v1344_v62  ;;  %v1355_v43 = vadd.f32 %v1350_v45, %v1343_v41  ;;  %v1358_v21 = vadd.f32 %v1350_v45, %v1346_v61  ;;  %v1357_v22 = vadd.f32 %v1350_v45, %v1345_v15  ;;  %v1901_v62 = vld [vmem:[%s1976_s10 + $0x30] sm:$0xff] }
 0x75f   : > { %v1360_v19 = vmul.f32 0.1, %v1352_v38  ;;  %v1359_v20 = vmul.f32 0.1, %v1351_v16  ;;  %v1362_v26 = vmul.f32 0.1, %v1354_v56 }
 0x760   : > { %v1361_v6 = vmul.f32 0.1, %v1353_v37  ;;  %v1364_v23 = vmul.f32 0.1, %v1356_v57  ;;  %v1363_v44 = vmul.f32 0.1, %v1355_v43 }
 0x761   : > { %v1368_v33 = vmax.f32 %v1352_v38, %v1360_v19  ;;  %v1367_v25 = vmax.f32 %v1351_v16, %v1359_v20  ;;  %v1370_v40 = vmax.f32 %v1354_v56, %v1362_v26  ;;  %v1366_v34 = vmul.f32 0.1, %v1358_v21 }
 0x762   : > { %v1369_v18 = vmax.f32 %v1353_v37, %v1361_v6  ;;  %v1372_v17 = vmax.f32 %v1356_v57, %v1364_v23  ;;  %v1371_v24 = vmax.f32 %v1355_v43, %v1363_v44  ;;  %v1365_v27 = vmul.f32 0.1, %v1357_v22 }
 0x763   : > { %1393 = vrot.lane.b32.xlu1 %v1368_v33, %s1910_s15  ;;  %1391 = vrot.lane.b32.xlu0 %v1367_v25, %s1910_s15  ;;  %v1374_v28 = vmax.f32 %v1358_v21, %v1366_v34  ;;  %v1376_v49 = vadd.f32 %v1894_v30, %v1368_v33  ;;  %v1375_v51 = vadd.f32 %v1895_v50, %v1367_v25 }
 0x764   : > { %v1373_v29 = vmax.f32 %v1357_v22, %v1365_v27  ;;  %v1378_v0 = vadd.f32 %v1896_v63, %v1370_v40  ;;  %v1377_v2 = vadd.f32 %v1897_v1, %v1369_v18  ;;  %v1380_v60 = vadd.f32 %v1898_v48, %v1372_v17 }
 0x765   : > { %v1379_v4 = vadd.f32 %v1899_v3, %v1371_v24  ;;  %v1382_v14 = vadd.f32 %v1900_v11, %v1374_v28 }
 0x766   : > { %v1381_v41 = vadd.f32 %v1901_v62, %v1373_v29 }
 0x767   : > { %1397 = vrot.lane.b32.xlu1 %v1370_v40, %s1910_s15  ;;  %1395 = vrot.lane.b32.xlu0 %v1369_v18, %s1910_s15 }
 0x76b   : > { %1401 = vrot.lane.b32.xlu1 %v1372_v17, %s1910_s15  ;;  %1399 = vrot.lane.b32.xlu0 %v1371_v24, %s1910_s15 }
 0x76f   : > { %1405 = vrot.lane.b32.xlu1 %v1374_v28, %s1910_s15  ;;  %1403 = vrot.lane.b32.xlu0 %v1373_v29, %s1910_s15  ;;  %s2313_s15 = scalar_lea.vmem %s2344_s6, %s1555_s7 }
 0x7d5   : > { %v1394_v52 = vpop.permute.xlu1 %1393  ;;  %v1392_v53 = vpop.permute.xlu0 %1391 }
 0x7d6   : > { %v1416_v54 = vadd.f32 %v1394_v52, %v1376_v49  ;;  %v1415_v55 = vadd.f32 %v1392_v53, %v1375_v51 }
 0x7d8   : > { %v1424_v58 = vmul.f32 0.1, %v1416_v54  ;;  %v1423_v59 = vmul.f32 0.1, %v1415_v55 }
 0x7d9   : > { %v1398_v47 = vpop.permute.xlu1 %1397  ;;  %v1396_v31 = vpop.permute.xlu0 %1395 }
 0x7da   : > { %v1432_v32 = vmax.f32 %v1416_v54, %v1424_v58  ;;  %v1431_v13 = vmax.f32 %v1415_v55, %v1423_v59  ;;  %v1418_v36 = vadd.f32 %v1398_v47, %v1378_v0  ;;  %v1417_v42 = vadd.f32 %v1396_v31, %v1377_v2 }
 0x7dc   : > { %1440 = vst.msk [vmem:[%s2313_s15 + $0x8] sm:$0xff] %vm264_vm0, %v1432_v32  ;;  %1439 = vst.msk [vmem:[%s2313_s15] sm:$0xff] %vm264_vm0, %v1431_v13  ;;  %v1426_v35 = vmul.f32 0.1, %v1418_v36  ;;  %v1425_v39 = vmul.f32 0.1, %v1417_v42 }
 0x7dd   : > { %v1402_v5 = vpop.permute.xlu1 %1401  ;;  %v1400_v7 = vpop.permute.xlu0 %1399 }
 0x7de   : > { %v1434_v46 = vmax.f32 %v1418_v36, %v1426_v35  ;;  %v1433_v8 = vmax.f32 %v1417_v42, %v1425_v39  ;;  %v1420_v12 = vadd.f32 %v1402_v5, %v1380_v60  ;;  %v1419_v45 = vadd.f32 %v1400_v7, %v1379_v4 }
 0x7e0   : > { %1442 = vst.msk [vmem:[%s2313_s15 + $0x18] sm:$0xff] %vm264_vm0, %v1434_v46  ;;  %1441 = vst.msk [vmem:[%s2313_s15 + $0x10] sm:$0xff] %vm264_vm0, %v1433_v8  ;;  %v1428_v9 = vmul.f32 0.1, %v1420_v12  ;;  %v1427_v10 = vmul.f32 0.1, %v1419_v45 }
 0x7e1   : > { %v1406_v61 = vpop.permute.xlu1 %1405  ;;  %v1404_v15 = vpop.permute.xlu0 %1403 }
 0x7e2   : > { %v1436_v38 = vmax.f32 %v1420_v12, %v1428_v9  ;;  %v1435_v16 = vmax.f32 %v1419_v45, %v1427_v10  ;;  %v1422_v56 = vadd.f32 %v1406_v61, %v1382_v14  ;;  %v1421_v37 = vadd.f32 %v1404_v15, %v1381_v41 }
 0x7e4   : > { %1444 = vst.msk [vmem:[%s2313_s15 + $0x28] sm:$0xff] %vm264_vm0, %v1436_v38  ;;  %1443 = vst.msk [vmem:[%s2313_s15 + $0x20] sm:$0xff] %vm264_vm0, %v1435_v16  ;;  %v1430_v19 = vmul.f32 0.1, %v1422_v56  ;;  %v1429_v20 = vmul.f32 0.1, %v1421_v37 }
 0x7e6   : > { %v1438_v57 = vmax.f32 %v1422_v56, %v1430_v19  ;;  %v1437_v43 = vmax.f32 %v1421_v37, %v1429_v20 }
 0x7e8   : > { %1446 = vst.msk [vmem:[%s2313_s15 + $0x38] sm:$0xff] %vm264_vm0, %v1438_v57  ;;  %1445 = vst.msk [vmem:[%s2313_s15 + $0x30] sm:$0xff] %vm264_vm0, %v1437_v43 }
 0x7e9 PF: > { %s16_s21 = sadd.s32 1, %s1908_s21  }
 0x7ea   : > { %p13_p4 = scmp.ge.s32.totalorder %s16_s21, 6  }
 0x7ec   :  { %15 = sbr.rel (!%p13_p4) target bundleno = 1 (0x1), region = 74 }

</bundles_post_ra>
